<compile_context>
chip_gen: v5e
topology: v5e:2x2
jax: 0.10.0
libtpu: 0.0.40
codegen_flags: <defaults>
</compile_context>

<pallas_src>
import math
import functools

import jax
import jax.numpy as jnp
from jax.experimental import pallas as pl
from jax.experimental.pallas import tpu as pltpu


# ---------------------------------------------------------------------------
# Kernel: one (batch-tile, layer) grid step
# ---------------------------------------------------------------------------
def _encoder_kernel(
    x_ref,                                   # (TB, S, D)   f32 input
    wq_ref, bq_ref, wk_ref, bk_ref,          # (1, D, D) bf16 / (1, 1, D) f32
    wv_ref, bv_ref, wo_ref, bo_ref,          # (1, D, D) bf16 / (1, 1, D) f32
    n1a_ref, n1b_ref, n2a_ref, n2b_ref,      # (1, 1, D) f32
    w1_ref, b1_ref,                          # (1, D, F) bf16 / (1, 1, F) f32
    w2_ref, b2_ref,                          # (1, F, D) bf16 / (1, 1, D) f32
    fna_ref, fnb_ref,                        # (1, 1, D) f32 (final Norm)
    o_ref,                                   # (TB, S, D)   output
    x_acc,                                   # (TB*S, D)    f32 scratch (carried)
    *, num_layers, heads, d_model, seq_len, tb, eps):
    d_k = d_model // heads
    scale = 1.0 / math.sqrt(d_k)
    m_rows = tb * seq_len
    l = pl.program_id(1)

    # --- initialize the carried activation at the first layer ---------------
    @pl.when(l == 0)
    def _init():
        x_acc[...] = x_ref[...].reshape(m_rows, d_model).astype(jnp.float32)

    def layer_norm(v, alpha, bias):
        # PyTorch Norm: alpha * (v - mean) / (std + eps) + bias, unbiased std.
        mean = jnp.mean(v, axis=-1, keepdims=True)
        c = v - mean
        var = jnp.sum(c * c, axis=-1, keepdims=True) * (1.0 / (d_model - 1))
        inv = pl.reciprocal(jnp.sqrt(var) + eps, approx=True)
        return alpha * (c * inv) + bias

    x = x_acc[...]                                           # (M, D) f32

    # --- self-attention sublayer --------------------------------------------
    x2 = layer_norm(x, n1a_ref[0], n1b_ref[0])
    x2b = x2.astype(jnp.bfloat16)
    q = jnp.dot(x2b, wq_ref[0], preferred_element_type=jnp.float32) + bq_ref[0]
    k = jnp.dot(x2b, wk_ref[0], preferred_element_type=jnp.float32) + bk_ref[0]
    v = jnp.dot(x2b, wv_ref[0], preferred_element_type=jnp.float32) + bv_ref[0]

    q3 = q.reshape(tb, seq_len, d_model).astype(jnp.bfloat16)
    k3 = k.reshape(tb, seq_len, d_model).astype(jnp.bfloat16)
    v3 = v.reshape(tb, seq_len, d_model).astype(jnp.bfloat16)
    wo = wo_ref[0]                                           # (D, D) bf16

    attn_out = jnp.zeros((m_rows, d_model), jnp.float32)
    for h in range(heads):                                   # static unroll
        sl = slice(h * d_k, (h + 1) * d_k)
        qh, kh, vh = q3[:, :, sl], k3[:, :, sl], v3[:, :, sl]
        # batched over the sequence tile; contraction on d_k (no transpose)
        s = jnp.einsum("bqd,bkd->bqk", qh, kh,
                       preferred_element_type=jnp.float32) * scale
        s = s - jnp.max(s, axis=-1, keepdims=True)
        p = jnp.exp(s)
        p = p * pl.reciprocal(jnp.sum(p, axis=-1, keepdims=True), approx=True)
        ctx = jnp.einsum("bqk,bkd->bqd", p.astype(jnp.bfloat16), vh,
                         preferred_element_type=jnp.float32)  # (tb, S, d_k)
        ctx2 = ctx.reshape(m_rows, d_k).astype(jnp.bfloat16)
        # concat @ Wo  ==  sum_h ctx_h @ Wo[h*d_k:(h+1)*d_k, :]  (no concat)
        attn_out = attn_out + jnp.dot(ctx2, wo[sl, :],
                                      preferred_element_type=jnp.float32)
    x = x + attn_out + bo_ref[0]

    # --- feed-forward sublayer ----------------------------------------------
    x2 = layer_norm(x, n2a_ref[0], n2b_ref[0])
    h1 = jnp.dot(x2.astype(jnp.bfloat16), w1_ref[0],
                 preferred_element_type=jnp.float32) + b1_ref[0]
    h1 = jnp.maximum(h1, 0.0)
    ff = jnp.dot(h1.astype(jnp.bfloat16), w2_ref[0],
                 preferred_element_type=jnp.float32) + b2_ref[0]
    x = x + ff

    x_acc[...] = x                                           # carry to next layer

    # --- final Norm + dense output store on the last layer ------------------
    @pl.when(l == num_layers - 1)
    def _final():
        y = layer_norm(x, fna_ref[0], fnb_ref[0])
        o_ref[...] = y.reshape(tb, seq_len, d_model).astype(o_ref.dtype)


# ---------------------------------------------------------------------------
# Wrapper
# ---------------------------------------------------------------------------
def _vmem_limit_bytes(tb, s, d, f):
    m = tb * s
    streamed = 2 * ((4 * d * d + 2 * d * f) * 2 + (8 * d + f) * 4)  # dbl-buffered layer params
    io = 2 * 2 * m * d * 4                                          # x / o blocks (dbl-buffered)
    acts = m * d * 4 * 10 + m * f * 4 * 3 + tb * s * s * 4 * 4      # residual + q/k/v + ffn + scores
    est = int((streamed + io + acts) * 1.5) + (4 << 20)
    return min(max(est, 16 << 20), 64 << 20)                        # valid on v7x (64 MiB VMEM)


def encoder_forward(src, params, *, num_layers, heads, tb=None):
    B, S, D = src.shape
    F = params["w1"].shape[-1]
    eps = 1e-6

    # Fuse batch into the matmul M dimension; target ~256 rows per tile.
    if tb is None:
        tb = min(B, max(1, 256 // S))
        while B % tb:
            tb -= 1
    assert B % tb == 0

    kernel = functools.partial(
        _encoder_kernel,
        num_layers=num_layers, heads=heads, d_model=D, seq_len=S, tb=tb, eps=eps)

    def layer_spec(r, c):            # streamed per-layer parameter
        return pl.BlockSpec((1, r, c), lambda b, l: (l, 0, 0))

    def const_spec(r, c):            # resident (final Norm) parameter
        return pl.BlockSpec((1, r, c), lambda b, l: (0, 0, 0))

    in_specs = [
        pl.BlockSpec((tb, S, D), lambda b, l: (b, 0, 0)),          # x
        layer_spec(D, D), layer_spec(1, D),                        # wq, bq
        layer_spec(D, D), layer_spec(1, D),                        # wk, bk
        layer_spec(D, D), layer_spec(1, D),                        # wv, bv
        layer_spec(D, D), layer_spec(1, D),                        # wo, bo
        layer_spec(1, D), layer_spec(1, D),                        # norm1 a/b
        layer_spec(1, D), layer_spec(1, D),                        # norm2 a/b
        layer_spec(D, F), layer_spec(1, F),                        # w1, b1
        layer_spec(F, D), layer_spec(1, D),                        # w2, b2
        const_spec(1, D), const_spec(1, D),                        # final norm a/b
    ]

    grid_spec = pltpu.PrefetchScalarGridSpec(
        num_scalar_prefetch=0,
        grid=(B // tb, num_layers),                                # layer axis last
        in_specs=in_specs,
        out_specs=pl.BlockSpec((tb, S, D), lambda b, l: (b, 0, 0)),
        scratch_shapes=[pltpu.VMEM((tb * S, D), jnp.float32)],     # carried activation
    )

    bf = jnp.bfloat16
    return pl.pallas_call(
        kernel,
        out_shape=jax.ShapeDtypeStruct((B, S, D), src.dtype),
        grid_spec=grid_spec,
        compiler_params=pltpu.CompilerParams(
            dimension_semantics=("parallel", "arbitrary"),
            vmem_limit_bytes=_vmem_limit_bytes(tb, S, D, F)),
    )(
        src,
        params["wq"].astype(bf), params["bq"], params["wk"].astype(bf), params["bk"],
        params["wv"].astype(bf), params["bv"], params["wo"].astype(bf), params["bo"],
        params["n1a"], params["n1b"], params["n2a"], params["n2b"],
        params["w1"].astype(bf), params["b1"], params["w2"].astype(bf), params["b2"],
        params["fna"], params["fnb"],
    )


# ---------------------------------------------------------------------------
# Pure-JAX reference (mirrors PyTorch semantics exactly, full f32)
# ---------------------------------------------------------------------------
def encoder_reference(src, params, *, num_layers, heads):
    B, S, D = src.shape
    d_k = D // heads
    eps = 1e-6

    def layer_norm(v, alpha, bias):
        mean = jnp.mean(v, axis=-1, keepdims=True)
        c = v - mean
        var = jnp.sum(c * c, axis=-1, keepdims=True) / (D - 1)
        return alpha * c / (jnp.sqrt(var) + eps) + bias

    x = src
    for i in range(num_layers):
        x2 = layer_norm(x, params["n1a"][i], params["n1b"][i])
        q = x2 @ params["wq"][i] + params["bq"][i]
        k = x2 @ params["wk"][i] + params["bk"][i]
        v = x2 @ params["wv"][i] + params["bv"][i]
        q = q.reshape(B, S, heads, d_k).transpose(0, 2, 1, 3)
        k = k.reshape(B, S, heads, d_k).transpose(0, 2, 1, 3)
        v = v.reshape(B, S, heads, d_k).transpose(0, 2, 1, 3)
        s = jnp.einsum("bhqd,bhkd->bhqk", q, k) / math.sqrt(d_k)
        p = jax.nn.softmax(s, axis=-1)
        o = jnp.einsum("bhqk,bhkd->bhqd", p, v)
        o = o.transpose(0, 2, 1, 3).reshape(B, S, D)
        x = x + (o @ params["wo"][i] + params["bo"][i])
        x2 = layer_norm(x, params["n2a"][i], params["n2b"][i])
        h1 = jax.nn.relu(x2 @ params["w1"][i] + params["b1"][i])
        x = x + (h1 @ params["w2"][i] + params["b2"][i])
    return layer_norm(x, params["fna"][0], params["fnb"][0])


# ---------------------------------------------------------------------------
# Parameter construction (deterministic, synthetic)
# ---------------------------------------------------------------------------
def make_params(key, *, num_layers, d_model, d_ff):
    keys = jax.random.split(key, 12)
    sc_d = 1.0 / math.sqrt(d_model)
    sc_f = 1.0 / math.sqrt(d_ff)

    def u(k, shape, scale):
        return jax.random.uniform(k, shape, jnp.float32, -scale, scale)

    N, D, F = num_layers, d_model, d_ff
    return {
        "wq": u(keys[0], (N, D, D), sc_d), "bq": u(keys[1], (N, 1, D), sc_d),
        "wk": u(keys[2], (N, D, D), sc_d), "bk": u(keys[3], (N, 1, D), sc_d),
        "wv": u(keys[4], (N, D, D), sc_d), "bv": u(keys[5], (N, 1, D), sc_d),
        "wo": u(keys[6], (N, D, D), sc_d), "bo": u(keys[7], (N, 1, D), sc_d),
        "n1a": jnp.ones((N, 1, D), jnp.float32),
        "n1b": jnp.zeros((N, 1, D), jnp.float32),
        "n2a": jnp.ones((N, 1, D), jnp.float32),
        "n2b": jnp.zeros((N, 1, D), jnp.float32),
        "w1": u(keys[8], (N, D, F), sc_d), "b1": u(keys[9], (N, 1, F), sc_d),
        "w2": u(keys[10], (N, F, D), sc_f), "b2": u(keys[11], (N, 1, D), sc_f),
        "fna": jnp.ones((1, 1, D), jnp.float32),
        "fnb": jnp.zeros((1, 1, D), jnp.float32),
    }


if __name__ == "__main__":
    # TODO(synk): dropout layers are identity (inference mode); training-mode
    # dropout / masking is not implemented.
    B, S, d_model, heads, num_layers, d_ff = 2, 8, 32, 4, 2, 256

    key = jax.random.PRNGKey(0)
    k_x, k_p = jax.random.split(key)
    src = jax.random.normal(k_x, (B, S, d_model), jnp.float32)
    params = make_params(k_p, num_layers=num_layers, d_model=d_model, d_ff=d_ff)

    out = encoder_forward(src, params, num_layers=num_layers, heads=heads)
    out = jax.block_until_ready(out)

    ref = encoder_reference(src, params, num_layers=num_layers, heads=heads)
    ref = jax.block_until_ready(ref)

    assert out.shape == (B, S, d_model)
    # bf16 MXU inputs vs f32 reference -> bf16-level tolerance.
    assert jnp.allclose(out, ref, atol=5e-2, rtol=5e-2), (
        float(jnp.max(jnp.abs(out - ref))))
    print("KERNEL_OK")
</pallas_src>

<mosaic_0001>
module attributes {stable_mosaic.version = 11 : i64} {
  func.func @_encoder_kernel(%arg0: i32, %arg1: i32, %arg2: memref<2x8x32xf32, #tpu.memory_space<vmem>>, %arg3: memref<1x32x32xbf16, #tpu.memory_space<vmem>>, %arg4: memref<1x1x32xf32, #tpu.memory_space<vmem>>, %arg5: memref<1x32x32xbf16, #tpu.memory_space<vmem>>, %arg6: memref<1x1x32xf32, #tpu.memory_space<vmem>>, %arg7: memref<1x32x32xbf16, #tpu.memory_space<vmem>>, %arg8: memref<1x1x32xf32, #tpu.memory_space<vmem>>, %arg9: memref<1x32x32xbf16, #tpu.memory_space<vmem>>, %arg10: memref<1x1x32xf32, #tpu.memory_space<vmem>>, %arg11: memref<1x1x32xf32, #tpu.memory_space<vmem>>, %arg12: memref<1x1x32xf32, #tpu.memory_space<vmem>>, %arg13: memref<1x1x32xf32, #tpu.memory_space<vmem>>, %arg14: memref<1x1x32xf32, #tpu.memory_space<vmem>>, %arg15: memref<1x32x256xbf16, #tpu.memory_space<vmem>>, %arg16: memref<1x1x256xf32, #tpu.memory_space<vmem>>, %arg17: memref<1x256x32xbf16, #tpu.memory_space<vmem>>, %arg18: memref<1x1x32xf32, #tpu.memory_space<vmem>>, %arg19: memref<1x1x32xf32, #tpu.memory_space<vmem>>, %arg20: memref<1x1x32xf32, #tpu.memory_space<vmem>>, %arg21: memref<2x8x32xf32, #tpu.memory_space<vmem>>, %arg22: memref<16x32xf32, #tpu.memory_space<vmem>>) attributes {dimension_semantics = [#tpu.dimension_semantics<parallel>, #tpu.dimension_semantics<arbitrary>], iteration_bounds = array<i64: 1, 2>, scalar_prefetch = 0 : i64, scratch_operands = 1 : i64, tpu.core_type = #tpu.core_type<tc>, window_params = [{transform_indices = @transform_0, window_bounds = array<i64: 2, 8, 32>}, {transform_indices = @transform_1, window_bounds = array<i64: 1, 32, 32>}, {transform_indices = @transform_2, window_bounds = array<i64: 1, 1, 32>}, {transform_indices = @transform_3, window_bounds = array<i64: 1, 32, 32>}, {transform_indices = @transform_4, window_bounds = array<i64: 1, 1, 32>}, {transform_indices = @transform_5, window_bounds = array<i64: 1, 32, 32>}, {transform_indices = @transform_6, window_bounds = array<i64: 1, 1, 32>}, {transform_indices = @transform_7, window_bounds = array<i64: 1, 32, 32>}, {transform_indices = @transform_8, window_bounds = array<i64: 1, 1, 32>}, {transform_indices = @transform_9, window_bounds = array<i64: 1, 1, 32>}, {transform_indices = @transform_10, window_bounds = array<i64: 1, 1, 32>}, {transform_indices = @transform_11, window_bounds = array<i64: 1, 1, 32>}, {transform_indices = @transform_12, window_bounds = array<i64: 1, 1, 32>}, {transform_indices = @transform_13, window_bounds = array<i64: 1, 32, 256>}, {transform_indices = @transform_14, window_bounds = array<i64: 1, 1, 256>}, {transform_indices = @transform_15, window_bounds = array<i64: 1, 256, 32>}, {transform_indices = @transform_16, window_bounds = array<i64: 1, 1, 32>}, {pipeline_mode = #tpu.pipeline_mode<synchronous>, transform_indices = @transform_17, window_bounds = array<i64: 1, 1, 32>}, {pipeline_mode = #tpu.pipeline_mode<synchronous>, transform_indices = @transform_18, window_bounds = array<i64: 1, 1, 32>}, {transform_indices = @transform_19, window_bounds = array<i64: 2, 8, 32>}]} {
    %c0_i32 = arith.constant 0 : i32
    %0 = arith.cmpi eq, %arg1, %c0_i32 : i32
    %1 = arith.extui %0 : i1 to i32
    %c0_i32_0 = arith.constant 0 : i32
    %2 = arith.cmpi ne, %1, %c0_i32_0 : i32
    scf.if %2 {
      %c0_93 = arith.constant 0 : index
      %c0_94 = arith.constant 0 : index
      %c0_95 = arith.constant 0 : index
      %205 = vector.load %arg2[%c0_93, %c0_94, %c0_95] : memref<2x8x32xf32, #tpu.memory_space<vmem>>, vector<2x8x32xf32>
      %206 = vector.shape_cast %205 : vector<2x8x32xf32> to vector<16x32xf32>
      %c0_96 = arith.constant 0 : index
      %c0_97 = arith.constant 0 : index
      %207 = vector.load %arg22[%c0_96, %c0_97] : memref<16x32xf32, #tpu.memory_space<vmem>>, vector<16x32xf32>
      tpu.vector_store %arg22[%c0_96, %c0_97], %206 {strides = array<i32>} : memref<16x32xf32, #tpu.memory_space<vmem>>, vector<16x32xf32>,
    } else {
    }
    %c0 = arith.constant 0 : index
    %c0_1 = arith.constant 0 : index
    %3 = vector.load %arg22[%c0, %c0_1] : memref<16x32xf32, #tpu.memory_space<vmem>>, vector<16x32xf32>
    %c0_2 = arith.constant 0 : index
    %c0_3 = arith.constant 0 : index
    %c0_4 = arith.constant 0 : index
    %4 = vector.load %arg11[%c0_2, %c0_3, %c0_4] : memref<1x1x32xf32, #tpu.memory_space<vmem>>, vector<1x1x32xf32>
    %5 = vector.shape_cast %4 : vector<1x1x32xf32> to vector<1x32xf32>
    %c0_5 = arith.constant 0 : index
    %c0_6 = arith.constant 0 : index
    %c0_7 = arith.constant 0 : index
    %6 = vector.load %arg12[%c0_5, %c0_6, %c0_7] : memref<1x1x32xf32, #tpu.memory_space<vmem>>, vector<1x1x32xf32>
    %7 = vector.shape_cast %6 : vector<1x1x32xf32> to vector<1x32xf32>
    %cst = arith.constant dense<0.000000e+00> : vector<16xf32>
    %8 = vector.multi_reduction <add>, %3, %cst [1] : vector<16x32xf32> to vector<16xf32>
    %9 = vector.shape_cast %8 : vector<16xf32> to vector<16x1xf32>
    %cst_8 = arith.constant 3.200000e+01 : f32
    %10 = vector.broadcast %cst_8 : f32 to vector<16x1xf32>
    %11 = arith.divf %9, %10 : vector<16x1xf32>
    %12 = vector.broadcast %11 : vector<16x1xf32> to vector<16x32xf32>
    %13 = arith.subf %3, %12 : vector<16x32xf32>
    %14 = arith.mulf %13, %13 : vector<16x32xf32>
    %cst_9 = arith.constant dense<0.000000e+00> : vector<16xf32>
    %15 = vector.multi_reduction <add>, %14, %cst_9 [1] : vector<16x32xf32> to vector<16xf32>
    %16 = vector.shape_cast %15 : vector<16xf32> to vector<16x1xf32>
    %cst_10 = arith.constant 0.0322580636 : f32
    %17 = vector.broadcast %cst_10 : f32 to vector<16x1xf32>
    %18 = arith.mulf %16, %17 : vector<16x1xf32>
    %19 = math.sqrt %18 : vector<16x1xf32>
    %cst_11 = arith.constant 9.99999997E-7 : f32
    %20 = vector.broadcast %cst_11 : f32 to vector<16x1xf32>
    %21 = arith.addf %19, %20 : vector<16x1xf32>
    %22 = tpu.reciprocal %21 {approx = true} : vector<16x1xf32> -> vector<16x1xf32>
    %23 = vector.broadcast %22 : vector<16x1xf32> to vector<16x32xf32>
    %24 = arith.mulf %13, %23 : vector<16x32xf32>
    %25 = vector.broadcast %5 : vector<1x32xf32> to vector<16x32xf32>
    %26 = arith.mulf %25, %24 : vector<16x32xf32>
    %27 = vector.broadcast %7 : vector<1x32xf32> to vector<16x32xf32>
    %28 = arith.addf %26, %27 : vector<16x32xf32>
    %29 = arith.truncf %28 : vector<16x32xf32> to vector<16x32xbf16>
    %c0_12 = arith.constant 0 : index
    %c0_13 = arith.constant 0 : index
    %c0_14 = arith.constant 0 : index
    %30 = vector.load %arg3[%c0_12, %c0_13, %c0_14] : memref<1x32x32xbf16, #tpu.memory_space<vmem>>, vector<1x32x32xbf16>
    %31 = vector.shape_cast %30 : vector<1x32x32xbf16> to vector<32x32xbf16>
    %cst_15 = arith.constant dense<0.000000e+00> : vector<16x32xf32>
    %32 = tpu.matmul %29, %31, %cst_15 {dimension_numbers = #tpu.dot_dimension_numbers<[1], [0], [0], [1], [0, 0, 1, 1], [], []>} : vector<16x32xbf16>, vector<32x32xbf16>, vector<16x32xf32> -> vector<16x32xf32>
    %c0_16 = arith.constant 0 : index
    %c0_17 = arith.constant 0 : index
    %c0_18 = arith.constant 0 : index
    %33 = vector.load %arg4[%c0_16, %c0_17, %c0_18] : memref<1x1x32xf32, #tpu.memory_space<vmem>>, vector<1x1x32xf32>
    %34 = vector.shape_cast %33 : vector<1x1x32xf32> to vector<1x32xf32>
    %35 = vector.broadcast %34 : vector<1x32xf32> to vector<16x32xf32>
    %36 = arith.addf %32, %35 : vector<16x32xf32>
    %c0_19 = arith.constant 0 : index
    %c0_20 = arith.constant 0 : index
    %c0_21 = arith.constant 0 : index
    %37 = vector.load %arg5[%c0_19, %c0_20, %c0_21] : memref<1x32x32xbf16, #tpu.memory_space<vmem>>, vector<1x32x32xbf16>
    %38 = vector.shape_cast %37 : vector<1x32x32xbf16> to vector<32x32xbf16>
    %cst_22 = arith.constant dense<0.000000e+00> : vector<16x32xf32>
    %39 = tpu.matmul %29, %38, %cst_22 {dimension_numbers = #tpu.dot_dimension_numbers<[1], [0], [0], [1], [0, 0, 1, 1], [], []>} : vector<16x32xbf16>, vector<32x32xbf16>, vector<16x32xf32> -> vector<16x32xf32>
    %c0_23 = arith.constant 0 : index
    %c0_24 = arith.constant 0 : index
    %c0_25 = arith.constant 0 : index
    %40 = vector.load %arg6[%c0_23, %c0_24, %c0_25] : memref<1x1x32xf32, #tpu.memory_space<vmem>>, vector<1x1x32xf32>
    %41 = vector.shape_cast %40 : vector<1x1x32xf32> to vector<1x32xf32>
    %42 = vector.broadcast %41 : vector<1x32xf32> to vector<16x32xf32>
    %43 = arith.addf %39, %42 : vector<16x32xf32>
    %c0_26 = arith.constant 0 : index
    %c0_27 = arith.constant 0 : index
    %c0_28 = arith.constant 0 : index
    %44 = vector.load %arg7[%c0_26, %c0_27, %c0_28] : memref<1x32x32xbf16, #tpu.memory_space<vmem>>, vector<1x32x32xbf16>
    %45 = vector.shape_cast %44 : vector<1x32x32xbf16> to vector<32x32xbf16>
    %cst_29 = arith.constant dense<0.000000e+00> : vector<16x32xf32>
    %46 = tpu.matmul %29, %45, %cst_29 {dimension_numbers = #tpu.dot_dimension_numbers<[1], [0], [0], [1], [0, 0, 1, 1], [], []>} : vector<16x32xbf16>, vector<32x32xbf16>, vector<16x32xf32> -> vector<16x32xf32>
    %c0_30 = arith.constant 0 : index
    %c0_31 = arith.constant 0 : index
    %c0_32 = arith.constant 0 : index
    %47 = vector.load %arg8[%c0_30, %c0_31, %c0_32] : memref<1x1x32xf32, #tpu.memory_space<vmem>>, vector<1x1x32xf32>
    %48 = vector.shape_cast %47 : vector<1x1x32xf32> to vector<1x32xf32>
    %49 = vector.broadcast %48 : vector<1x32xf32> to vector<16x32xf32>
    %50 = arith.addf %46, %49 : vector<16x32xf32>
    %51 = vector.shape_cast %36 : vector<16x32xf32> to vector<2x8x32xf32>
    %52 = arith.truncf %51 : vector<2x8x32xf32> to vector<2x8x32xbf16>
    %53 = vector.shape_cast %43 : vector<16x32xf32> to vector<2x8x32xf32>
    %54 = arith.truncf %53 : vector<2x8x32xf32> to vector<2x8x32xbf16>
    %55 = vector.shape_cast %50 : vector<16x32xf32> to vector<2x8x32xf32>
    %56 = arith.truncf %55 : vector<2x8x32xf32> to vector<2x8x32xbf16>
    %c0_33 = arith.constant 0 : index
    %c0_34 = arith.constant 0 : index
    %c0_35 = arith.constant 0 : index
    %57 = vector.load %arg9[%c0_33, %c0_34, %c0_35] : memref<1x32x32xbf16, #tpu.memory_space<vmem>>, vector<1x32x32xbf16>
    %58 = vector.shape_cast %57 : vector<1x32x32xbf16> to vector<32x32xbf16>
    %cst_36 = arith.constant 0.000000e+00 : f32
    %59 = vector.broadcast %cst_36 : f32 to vector<16x32xf32>
    %60 = vector.extract_strided_slice %52 {offsets = [0, 0, 0], sizes = [2, 8, 8], strides = [1, 1, 1]} : vector<2x8x32xbf16> to vector<2x8x8xbf16>
    %61 = vector.extract_strided_slice %54 {offsets = [0, 0, 0], sizes = [2, 8, 8], strides = [1, 1, 1]} : vector<2x8x32xbf16> to vector<2x8x8xbf16>
    %62 = vector.extract_strided_slice %56 {offsets = [0, 0, 0], sizes = [2, 8, 8], strides = [1, 1, 1]} : vector<2x8x32xbf16> to vector<2x8x8xbf16>
    "tpu.trace_start"() <{level = 10 : i32, message = "bqd,bkd->bqk"}> : () -> ()
    %cst_37 = arith.constant dense<0.000000e+00> : vector<2x8x8xf32>
    %63 = tpu.matmul %60, %61, %cst_37 {dimension_numbers = #tpu.dot_dimension_numbers<[2], [2], [1], [1], [0, 0, 0, 1, 1, 1], [0], [0]>} : vector<2x8x8xbf16>, vector<2x8x8xbf16>, vector<2x8x8xf32> -> vector<2x8x8xf32>
    "tpu.trace_stop"() : () -> ()
    %cst_38 = arith.constant 0.353553385 : f32
    %64 = vector.broadcast %cst_38 : f32 to vector<2x8x8xf32>
    %65 = arith.mulf %63, %64 : vector<2x8x8xf32>
    %cst_39 = arith.constant dense<0xFF800000> : vector<2x8xf32>
    %66 = vector.multi_reduction <maximumf>, %65, %cst_39 [2] : vector<2x8x8xf32> to vector<2x8xf32>
    %67 = vector.shape_cast %66 : vector<2x8xf32> to vector<2x8x1xf32>
    %68 = vector.broadcast %67 : vector<2x8x1xf32> to vector<2x8x8xf32>
    %69 = arith.subf %65, %68 : vector<2x8x8xf32>
    %70 = math.exp %69 : vector<2x8x8xf32>
    %cst_40 = arith.constant dense<0.000000e+00> : vector<2x8xf32>
    %71 = vector.multi_reduction <add>, %70, %cst_40 [2] : vector<2x8x8xf32> to vector<2x8xf32>
    %72 = vector.shape_cast %71 : vector<2x8xf32> to vector<2x8x1xf32>
    %73 = tpu.reciprocal %72 {approx = true} : vector<2x8x1xf32> -> vector<2x8x1xf32>
    %74 = vector.broadcast %73 : vector<2x8x1xf32> to vector<2x8x8xf32>
    %75 = arith.mulf %70, %74 : vector<2x8x8xf32>
    %76 = arith.truncf %75 : vector<2x8x8xf32> to vector<2x8x8xbf16>
    "tpu.trace_start"() <{level = 10 : i32, message = "bqk,bkd->bqd"}> : () -> ()
    %cst_41 = arith.constant dense<0.000000e+00> : vector<2x8x8xf32>
    %77 = tpu.matmul %76, %62, %cst_41 {dimension_numbers = #tpu.dot_dimension_numbers<[2], [1], [1], [2], [0, 0, 0, 1, 1, 2], [0], [0]>} : vector<2x8x8xbf16>, vector<2x8x8xbf16>, vector<2x8x8xf32> -> vector<2x8x8xf32>
    "tpu.trace_stop"() : () -> ()
    %78 = vector.shape_cast %77 : vector<2x8x8xf32> to vector<16x8xf32>
    %79 = arith.truncf %78 : vector<16x8xf32> to vector<16x8xbf16>
    %80 = vector.extract_strided_slice %58 {offsets = [0, 0], sizes = [8, 32], strides = [1, 1]} : vector<32x32xbf16> to vector<8x32xbf16>
    %cst_42 = arith.constant dense<0.000000e+00> : vector<16x32xf32>
    %81 = tpu.matmul %79, %80, %cst_42 {dimension_numbers = #tpu.dot_dimension_numbers<[1], [0], [0], [1], [0, 0, 1, 1], [], []>} : vector<16x8xbf16>, vector<8x32xbf16>, vector<16x32xf32> -> vector<16x32xf32>
    %82 = arith.addf %59, %81 : vector<16x32xf32>
    %83 = vector.extract_strided_slice %52 {offsets = [0, 0, 8], sizes = [2, 8, 8], strides = [1, 1, 1]} : vector<2x8x32xbf16> to vector<2x8x8xbf16>
    %84 = vector.extract_strided_slice %54 {offsets = [0, 0, 8], sizes = [2, 8, 8], strides = [1, 1, 1]} : vector<2x8x32xbf16> to vector<2x8x8xbf16>
    %85 = vector.extract_strided_slice %56 {offsets = [0, 0, 8], sizes = [2, 8, 8], strides = [1, 1, 1]} : vector<2x8x32xbf16> to vector<2x8x8xbf16>
    "tpu.trace_start"() <{level = 10 : i32, message = "bqd,bkd->bqk"}> : () -> ()
    %cst_43 = arith.constant dense<0.000000e+00> : vector<2x8x8xf32>
    %86 = tpu.matmul %83, %84, %cst_43 {dimension_numbers = #tpu.dot_dimension_numbers<[2], [2], [1], [1], [0, 0, 0, 1, 1, 1], [0], [0]>} : vector<2x8x8xbf16>, vector<2x8x8xbf16>, vector<2x8x8xf32> -> vector<2x8x8xf32>
    "tpu.trace_stop"() : () -> ()
    %cst_44 = arith.constant 0.353553385 : f32
    %87 = vector.broadcast %cst_44 : f32 to vector<2x8x8xf32>
    %88 = arith.mulf %86, %87 : vector<2x8x8xf32>
    %cst_45 = arith.constant dense<0xFF800000> : vector<2x8xf32>
    %89 = vector.multi_reduction <maximumf>, %88, %cst_45 [2] : vector<2x8x8xf32> to vector<2x8xf32>
    %90 = vector.shape_cast %89 : vector<2x8xf32> to vector<2x8x1xf32>
    %91 = vector.broadcast %90 : vector<2x8x1xf32> to vector<2x8x8xf32>
    %92 = arith.subf %88, %91 : vector<2x8x8xf32>
    %93 = math.exp %92 : vector<2x8x8xf32>
    %cst_46 = arith.constant dense<0.000000e+00> : vector<2x8xf32>
    %94 = vector.multi_reduction <add>, %93, %cst_46 [2] : vector<2x8x8xf32> to vector<2x8xf32>
    %95 = vector.shape_cast %94 : vector<2x8xf32> to vector<2x8x1xf32>
    %96 = tpu.reciprocal %95 {approx = true} : vector<2x8x1xf32> -> vector<2x8x1xf32>
    %97 = vector.broadcast %96 : vector<2x8x1xf32> to vector<2x8x8xf32>
    %98 = arith.mulf %93, %97 : vector<2x8x8xf32>
    %99 = arith.truncf %98 : vector<2x8x8xf32> to vector<2x8x8xbf16>
    "tpu.trace_start"() <{level = 10 : i32, message = "bqk,bkd->bqd"}> : () -> ()
    %cst_47 = arith.constant dense<0.000000e+00> : vector<2x8x8xf32>
    %100 = tpu.matmul %99, %85, %cst_47 {dimension_numbers = #tpu.dot_dimension_numbers<[2], [1], [1], [2], [0, 0, 0, 1, 1, 2], [0], [0]>} : vector<2x8x8xbf16>, vector<2x8x8xbf16>, vector<2x8x8xf32> -> vector<2x8x8xf32>
    "tpu.trace_stop"() : () -> ()
    %101 = vector.shape_cast %100 : vector<2x8x8xf32> to vector<16x8xf32>
    %102 = arith.truncf %101 : vector<16x8xf32> to vector<16x8xbf16>
    %103 = vector.extract_strided_slice %58 {offsets = [8, 0], sizes = [8, 32], strides = [1, 1]} : vector<32x32xbf16> to vector<8x32xbf16>
    %cst_48 = arith.constant dense<0.000000e+00> : vector<16x32xf32>
    %104 = tpu.matmul %102, %103, %cst_48 {dimension_numbers = #tpu.dot_dimension_numbers<[1], [0], [0], [1], [0, 0, 1, 1], [], []>} : vector<16x8xbf16>, vector<8x32xbf16>, vector<16x32xf32> -> vector<16x32xf32>
    %105 = arith.addf %82, %104 : vector<16x32xf32>
    %106 = vector.extract_strided_slice %52 {offsets = [0, 0, 16], sizes = [2, 8, 8], strides = [1, 1, 1]} : vector<2x8x32xbf16> to vector<2x8x8xbf16>
    %107 = vector.extract_strided_slice %54 {offsets = [0, 0, 16], sizes = [2, 8, 8], strides = [1, 1, 1]} : vector<2x8x32xbf16> to vector<2x8x8xbf16>
    %108 = vector.extract_strided_slice %56 {offsets = [0, 0, 16], sizes = [2, 8, 8], strides = [1, 1, 1]} : vector<2x8x32xbf16> to vector<2x8x8xbf16>
    "tpu.trace_start"() <{level = 10 : i32, message = "bqd,bkd->bqk"}> : () -> ()
    %cst_49 = arith.constant dense<0.000000e+00> : vector<2x8x8xf32>
    %109 = tpu.matmul %106, %107, %cst_49 {dimension_numbers = #tpu.dot_dimension_numbers<[2], [2], [1], [1], [0, 0, 0, 1, 1, 1], [0], [0]>} : vector<2x8x8xbf16>, vector<2x8x8xbf16>, vector<2x8x8xf32> -> vector<2x8x8xf32>
    "tpu.trace_stop"() : () -> ()
    %cst_50 = arith.constant 0.353553385 : f32
    %110 = vector.broadcast %cst_50 : f32 to vector<2x8x8xf32>
    %111 = arith.mulf %109, %110 : vector<2x8x8xf32>
    %cst_51 = arith.constant dense<0xFF800000> : vector<2x8xf32>
    %112 = vector.multi_reduction <maximumf>, %111, %cst_51 [2] : vector<2x8x8xf32> to vector<2x8xf32>
    %113 = vector.shape_cast %112 : vector<2x8xf32> to vector<2x8x1xf32>
    %114 = vector.broadcast %113 : vector<2x8x1xf32> to vector<2x8x8xf32>
    %115 = arith.subf %111, %114 : vector<2x8x8xf32>
    %116 = math.exp %115 : vector<2x8x8xf32>
    %cst_52 = arith.constant dense<0.000000e+00> : vector<2x8xf32>
    %117 = vector.multi_reduction <add>, %116, %cst_52 [2] : vector<2x8x8xf32> to vector<2x8xf32>
    %118 = vector.shape_cast %117 : vector<2x8xf32> to vector<2x8x1xf32>
    %119 = tpu.reciprocal %118 {approx = true} : vector<2x8x1xf32> -> vector<2x8x1xf32>
    %120 = vector.broadcast %119 : vector<2x8x1xf32> to vector<2x8x8xf32>
    %121 = arith.mulf %116, %120 : vector<2x8x8xf32>
    %122 = arith.truncf %121 : vector<2x8x8xf32> to vector<2x8x8xbf16>
    "tpu.trace_start"() <{level = 10 : i32, message = "bqk,bkd->bqd"}> : () -> ()
    %cst_53 = arith.constant dense<0.000000e+00> : vector<2x8x8xf32>
    %123 = tpu.matmul %122, %108, %cst_53 {dimension_numbers = #tpu.dot_dimension_numbers<[2], [1], [1], [2], [0, 0, 0, 1, 1, 2], [0], [0]>} : vector<2x8x8xbf16>, vector<2x8x8xbf16>, vector<2x8x8xf32> -> vector<2x8x8xf32>
    "tpu.trace_stop"() : () -> ()
    %124 = vector.shape_cast %123 : vector<2x8x8xf32> to vector<16x8xf32>
    %125 = arith.truncf %124 : vector<16x8xf32> to vector<16x8xbf16>
    %126 = vector.extract_strided_slice %58 {offsets = [16, 0], sizes = [8, 32], strides = [1, 1]} : vector<32x32xbf16> to vector<8x32xbf16>
    %cst_54 = arith.constant dense<0.000000e+00> : vector<16x32xf32>
    %127 = tpu.matmul %125, %126, %cst_54 {dimension_numbers = #tpu.dot_dimension_numbers<[1], [0], [0], [1], [0, 0, 1, 1], [], []>} : vector<16x8xbf16>, vector<8x32xbf16>, vector<16x32xf32> -> vector<16x32xf32>
    %128 = arith.addf %105, %127 : vector<16x32xf32>
    %129 = vector.extract_strided_slice %52 {offsets = [0, 0, 24], sizes = [2, 8, 8], strides = [1, 1, 1]} : vector<2x8x32xbf16> to vector<2x8x8xbf16>
    %130 = vector.extract_strided_slice %54 {offsets = [0, 0, 24], sizes = [2, 8, 8], strides = [1, 1, 1]} : vector<2x8x32xbf16> to vector<2x8x8xbf16>
    %131 = vector.extract_strided_slice %56 {offsets = [0, 0, 24], sizes = [2, 8, 8], strides = [1, 1, 1]} : vector<2x8x32xbf16> to vector<2x8x8xbf16>
    "tpu.trace_start"() <{level = 10 : i32, message = "bqd,bkd->bqk"}> : () -> ()
    %cst_55 = arith.constant dense<0.000000e+00> : vector<2x8x8xf32>
    %132 = tpu.matmul %129, %130, %cst_55 {dimension_numbers = #tpu.dot_dimension_numbers<[2], [2], [1], [1], [0, 0, 0, 1, 1, 1], [0], [0]>} : vector<2x8x8xbf16>, vector<2x8x8xbf16>, vector<2x8x8xf32> -> vector<2x8x8xf32>
    "tpu.trace_stop"() : () -> ()
    %cst_56 = arith.constant 0.353553385 : f32
    %133 = vector.broadcast %cst_56 : f32 to vector<2x8x8xf32>
    %134 = arith.mulf %132, %133 : vector<2x8x8xf32>
    %cst_57 = arith.constant dense<0xFF800000> : vector<2x8xf32>
    %135 = vector.multi_reduction <maximumf>, %134, %cst_57 [2] : vector<2x8x8xf32> to vector<2x8xf32>
    %136 = vector.shape_cast %135 : vector<2x8xf32> to vector<2x8x1xf32>
    %137 = vector.broadcast %136 : vector<2x8x1xf32> to vector<2x8x8xf32>
    %138 = arith.subf %134, %137 : vector<2x8x8xf32>
    %139 = math.exp %138 : vector<2x8x8xf32>
    %cst_58 = arith.constant dense<0.000000e+00> : vector<2x8xf32>
    %140 = vector.multi_reduction <add>, %139, %cst_58 [2] : vector<2x8x8xf32> to vector<2x8xf32>
    %141 = vector.shape_cast %140 : vector<2x8xf32> to vector<2x8x1xf32>
    %142 = tpu.reciprocal %141 {approx = true} : vector<2x8x1xf32> -> vector<2x8x1xf32>
    %143 = vector.broadcast %142 : vector<2x8x1xf32> to vector<2x8x8xf32>
    %144 = arith.mulf %139, %143 : vector<2x8x8xf32>
    %145 = arith.truncf %144 : vector<2x8x8xf32> to vector<2x8x8xbf16>
    "tpu.trace_start"() <{level = 10 : i32, message = "bqk,bkd->bqd"}> : () -> ()
    %cst_59 = arith.constant dense<0.000000e+00> : vector<2x8x8xf32>
    %146 = tpu.matmul %145, %131, %cst_59 {dimension_numbers = #tpu.dot_dimension_numbers<[2], [1], [1], [2], [0, 0, 0, 1, 1, 2], [0], [0]>} : vector<2x8x8xbf16>, vector<2x8x8xbf16>, vector<2x8x8xf32> -> vector<2x8x8xf32>
    "tpu.trace_stop"() : () -> ()
    %147 = vector.shape_cast %146 : vector<2x8x8xf32> to vector<16x8xf32>
    %148 = arith.truncf %147 : vector<16x8xf32> to vector<16x8xbf16>
    %149 = vector.extract_strided_slice %58 {offsets = [24, 0], sizes = [8, 32], strides = [1, 1]} : vector<32x32xbf16> to vector<8x32xbf16>
    %cst_60 = arith.constant dense<0.000000e+00> : vector<16x32xf32>
    %150 = tpu.matmul %148, %149, %cst_60 {dimension_numbers = #tpu.dot_dimension_numbers<[1], [0], [0], [1], [0, 0, 1, 1], [], []>} : vector<16x8xbf16>, vector<8x32xbf16>, vector<16x32xf32> -> vector<16x32xf32>
    %151 = arith.addf %128, %150 : vector<16x32xf32>
    %152 = arith.addf %3, %151 : vector<16x32xf32>
    %c0_61 = arith.constant 0 : index
    %c0_62 = arith.constant 0 : index
    %c0_63 = arith.constant 0 : index
    %153 = vector.load %arg10[%c0_61, %c0_62, %c0_63] : memref<1x1x32xf32, #tpu.memory_space<vmem>>, vector<1x1x32xf32>
    %154 = vector.shape_cast %153 : vector<1x1x32xf32> to vector<1x32xf32>
    %155 = vector.broadcast %154 : vector<1x32xf32> to vector<16x32xf32>
    %156 = arith.addf %152, %155 : vector<16x32xf32>
    %c0_64 = arith.constant 0 : index
    %c0_65 = arith.constant 0 : index
    %c0_66 = arith.constant 0 : index
    %157 = vector.load %arg13[%c0_64, %c0_65, %c0_66] : memref<1x1x32xf32, #tpu.memory_space<vmem>>, vector<1x1x32xf32>
    %158 = vector.shape_cast %157 : vector<1x1x32xf32> to vector<1x32xf32>
    %c0_67 = arith.constant 0 : index
    %c0_68 = arith.constant 0 : index
    %c0_69 = arith.constant 0 : index
    %159 = vector.load %arg14[%c0_67, %c0_68, %c0_69] : memref<1x1x32xf32, #tpu.memory_space<vmem>>, vector<1x1x32xf32>
    %160 = vector.shape_cast %159 : vector<1x1x32xf32> to vector<1x32xf32>
    %cst_70 = arith.constant dense<0.000000e+00> : vector<16xf32>
    %161 = vector.multi_reduction <add>, %156, %cst_70 [1] : vector<16x32xf32> to vector<16xf32>
    %162 = vector.shape_cast %161 : vector<16xf32> to vector<16x1xf32>
    %cst_71 = arith.constant 3.200000e+01 : f32
    %163 = vector.broadcast %cst_71 : f32 to vector<16x1xf32>
    %164 = arith.divf %162, %163 : vector<16x1xf32>
    %165 = vector.broadcast %164 : vector<16x1xf32> to vector<16x32xf32>
    %166 = arith.subf %156, %165 : vector<16x32xf32>
    %167 = arith.mulf %166, %166 : vector<16x32xf32>
    %cst_72 = arith.constant dense<0.000000e+00> : vector<16xf32>
    %168 = vector.multi_reduction <add>, %167, %cst_72 [1] : vector<16x32xf32> to vector<16xf32>
    %169 = vector.shape_cast %168 : vector<16xf32> to vector<16x1xf32>
    %cst_73 = arith.constant 0.0322580636 : f32
    %170 = vector.broadcast %cst_73 : f32 to vector<16x1xf32>
    %171 = arith.mulf %169, %170 : vector<16x1xf32>
    %172 = math.sqrt %171 : vector<16x1xf32>
    %cst_74 = arith.constant 9.99999997E-7 : f32
    %173 = vector.broadcast %cst_74 : f32 to vector<16x1xf32>
    %174 = arith.addf %172, %173 : vector<16x1xf32>
    %175 = tpu.reciprocal %174 {approx = true} : vector<16x1xf32> -> vector<16x1xf32>
    %176 = vector.broadcast %175 : vector<16x1xf32> to vector<16x32xf32>
    %177 = arith.mulf %166, %176 : vector<16x32xf32>
    %178 = vector.broadcast %158 : vector<1x32xf32> to vector<16x32xf32>
    %179 = arith.mulf %178, %177 : vector<16x32xf32>
    %180 = vector.broadcast %160 : vector<1x32xf32> to vector<16x32xf32>
    %181 = arith.addf %179, %180 : vector<16x32xf32>
    %182 = arith.truncf %181 : vector<16x32xf32> to vector<16x32xbf16>
    %c0_75 = arith.constant 0 : index
    %c0_76 = arith.constant 0 : index
    %c0_77 = arith.constant 0 : index
    %183 = vector.load %arg15[%c0_75, %c0_76, %c0_77] : memref<1x32x256xbf16, #tpu.memory_space<vmem>>, vector<1x32x256xbf16>
    %184 = vector.shape_cast %183 : vector<1x32x256xbf16> to vector<32x256xbf16>
    %cst_78 = arith.constant dense<0.000000e+00> : vector<16x256xf32>
    %185 = tpu.matmul %182, %184, %cst_78 {dimension_numbers = #tpu.dot_dimension_numbers<[1], [0], [0], [1], [0, 0, 1, 1], [], []>} : vector<16x32xbf16>, vector<32x256xbf16>, vector<16x256xf32> -> vector<16x256xf32>
    %c0_79 = arith.constant 0 : index
    %c0_80 = arith.constant 0 : index
    %c0_81 = arith.constant 0 : index
    %186 = vector.load %arg16[%c0_79, %c0_80, %c0_81] : memref<1x1x256xf32, #tpu.memory_space<vmem>>, vector<1x1x256xf32>
    %187 = vector.shape_cast %186 : vector<1x1x256xf32> to vector<1x256xf32>
    %188 = vector.broadcast %187 : vector<1x256xf32> to vector<16x256xf32>
    %189 = arith.addf %185, %188 : vector<16x256xf32>
    %cst_82 = arith.constant 0.000000e+00 : f32
    %190 = vector.broadcast %cst_82 : f32 to vector<16x256xf32>
    %191 = arith.maximumf %189, %190 : vector<16x256xf32>
    %192 = arith.truncf %191 : vector<16x256xf32> to vector<16x256xbf16>
    %c0_83 = arith.constant 0 : index
    %c0_84 = arith.constant 0 : index
    %c0_85 = arith.constant 0 : index
    %193 = vector.load %arg17[%c0_83, %c0_84, %c0_85] : memref<1x256x32xbf16, #tpu.memory_space<vmem>>, vector<1x256x32xbf16>
    %194 = vector.shape_cast %193 : vector<1x256x32xbf16> to vector<256x32xbf16>
    %cst_86 = arith.constant dense<0.000000e+00> : vector<16x32xf32>
    %195 = tpu.matmul %192, %194, %cst_86 {dimension_numbers = #tpu.dot_dimension_numbers<[1], [0], [0], [1], [0, 0, 1, 1], [], []>} : vector<16x256xbf16>, vector<256x32xbf16>, vector<16x32xf32> -> vector<16x32xf32>
    %c0_87 = arith.constant 0 : index
    %c0_88 = arith.constant 0 : index
    %c0_89 = arith.constant 0 : index
    %196 = vector.load %arg18[%c0_87, %c0_88, %c0_89] : memref<1x1x32xf32, #tpu.memory_space<vmem>>, vector<1x1x32xf32>
    %197 = vector.shape_cast %196 : vector<1x1x32xf32> to vector<1x32xf32>
    %198 = vector.broadcast %197 : vector<1x32xf32> to vector<16x32xf32>
    %199 = arith.addf %195, %198 : vector<16x32xf32>
    %200 = arith.addf %156, %199 : vector<16x32xf32>
    %c0_90 = arith.constant 0 : index
    %c0_91 = arith.constant 0 : index
    %201 = vector.load %arg22[%c0_90, %c0_91] : memref<16x32xf32, #tpu.memory_space<vmem>>, vector<16x32xf32>
    tpu.vector_store %arg22[%c0_90, %c0_91], %200 {strides = array<i32>} : memref<16x32xf32, #tpu.memory_space<vmem>>, vector<16x32xf32>,
    %c1_i32 = arith.constant 1 : i32
    %202 = arith.cmpi eq, %arg1, %c1_i32 : i32
    %203 = arith.extui %202 : i1 to i32
    %c0_i32_92 = arith.constant 0 : i32
    %204 = arith.cmpi ne, %203, %c0_i32_92 : i32
    scf.if %204 {
      %c0_93 = arith.constant 0 : index
      %c0_94 = arith.constant 0 : index
      %c0_95 = arith.constant 0 : index
      %205 = vector.load %arg19[%c0_93, %c0_94, %c0_95] : memref<1x1x32xf32, #tpu.memory_space<vmem>>, vector<1x1x32xf32>
      %206 = vector.shape_cast %205 : vector<1x1x32xf32> to vector<1x32xf32>
      %c0_96 = arith.constant 0 : index
      %c0_97 = arith.constant 0 : index
      %c0_98 = arith.constant 0 : index
      %207 = vector.load %arg20[%c0_96, %c0_97, %c0_98] : memref<1x1x32xf32, #tpu.memory_space<vmem>>, vector<1x1x32xf32>
      %208 = vector.shape_cast %207 : vector<1x1x32xf32> to vector<1x32xf32>
      %cst_99 = arith.constant dense<0.000000e+00> : vector<16xf32>
      %209 = vector.multi_reduction <add>, %200, %cst_99 [1] : vector<16x32xf32> to vector<16xf32>
      %210 = vector.shape_cast %209 : vector<16xf32> to vector<16x1xf32>
      %cst_100 = arith.constant 3.200000e+01 : f32
      %211 = vector.broadcast %cst_100 : f32 to vector<16x1xf32>
      %212 = arith.divf %210, %211 : vector<16x1xf32>
      %213 = vector.broadcast %212 : vector<16x1xf32> to vector<16x32xf32>
      %214 = arith.subf %200, %213 : vector<16x32xf32>
      %215 = arith.mulf %214, %214 : vector<16x32xf32>
      %cst_101 = arith.constant dense<0.000000e+00> : vector<16xf32>
      %216 = vector.multi_reduction <add>, %215, %cst_101 [1] : vector<16x32xf32> to vector<16xf32>
      %217 = vector.shape_cast %216 : vector<16xf32> to vector<16x1xf32>
      %cst_102 = arith.constant 0.0322580636 : f32
      %218 = vector.broadcast %cst_102 : f32 to vector<16x1xf32>
      %219 = arith.mulf %217, %218 : vector<16x1xf32>
      %220 = math.sqrt %219 : vector<16x1xf32>
      %cst_103 = arith.constant 9.99999997E-7 : f32
      %221 = vector.broadcast %cst_103 : f32 to vector<16x1xf32>
      %222 = arith.addf %220, %221 : vector<16x1xf32>
      %223 = tpu.reciprocal %222 {approx = true} : vector<16x1xf32> -> vector<16x1xf32>
      %224 = vector.broadcast %223 : vector<16x1xf32> to vector<16x32xf32>
      %225 = arith.mulf %214, %224 : vector<16x32xf32>
      %226 = vector.broadcast %206 : vector<1x32xf32> to vector<16x32xf32>
      %227 = arith.mulf %226, %225 : vector<16x32xf32>
      %228 = vector.broadcast %208 : vector<1x32xf32> to vector<16x32xf32>
      %229 = arith.addf %227, %228 : vector<16x32xf32>
      %230 = vector.shape_cast %229 : vector<16x32xf32> to vector<2x8x32xf32>
      %c0_104 = arith.constant 0 : index
      %c0_105 = arith.constant 0 : index
      %c0_106 = arith.constant 0 : index
      %231 = vector.load %arg21[%c0_104, %c0_105, %c0_106] : memref<2x8x32xf32, #tpu.memory_space<vmem>>, vector<2x8x32xf32>
      tpu.vector_store %arg21[%c0_104, %c0_105, %c0_106], %230 {strides = array<i32>} : memref<2x8x32xf32, #tpu.memory_space<vmem>>, vector<2x8x32xf32>,
    } else {
    }
    return
  }
  func.func @transform_0(%arg0: i32, %arg1: i32) -> (i32, i32, i32) {
    %c0_i32 = arith.constant 0 : i32
    %c0_i32_0 = arith.constant 0 : i32
    %c0_i32_1 = arith.constant 0 : i32
    return %arg0, %c0_i32, %c0_i32_0 : i32, i32, i32
  }
  func.func @transform_1(%arg0: i32, %arg1: i32) -> (i32, i32, i32) {
    %c0_i32 = arith.constant 0 : i32
    %c0_i32_0 = arith.constant 0 : i32
    %c0_i32_1 = arith.constant 0 : i32
    return %arg1, %c0_i32, %c0_i32_0 : i32, i32, i32
  }
  func.func @transform_2(%arg0: i32, %arg1: i32) -> (i32, i32, i32) {
    %c0_i32 = arith.constant 0 : i32
    %c0_i32_0 = arith.constant 0 : i32
    %c0_i32_1 = arith.constant 0 : i32
    return %arg1, %c0_i32, %c0_i32_0 : i32, i32, i32
  }
  func.func @transform_3(%arg0: i32, %arg1: i32) -> (i32, i32, i32) {
    %c0_i32 = arith.constant 0 : i32
    %c0_i32_0 = arith.constant 0 : i32
    %c0_i32_1 = arith.constant 0 : i32
    return %arg1, %c0_i32, %c0_i32_0 : i32, i32, i32
  }
  func.func @transform_4(%arg0: i32, %arg1: i32) -> (i32, i32, i32) {
    %c0_i32 = arith.constant 0 : i32
    %c0_i32_0 = arith.constant 0 : i32
    %c0_i32_1 = arith.constant 0 : i32
    return %arg1, %c0_i32, %c0_i32_0 : i32, i32, i32
  }
  func.func @transform_5(%arg0: i32, %arg1: i32) -> (i32, i32, i32) {
    %c0_i32 = arith.constant 0 : i32
    %c0_i32_0 = arith.constant 0 : i32
    %c0_i32_1 = arith.constant 0 : i32
    return %arg1, %c0_i32, %c0_i32_0 : i32, i32, i32
  }
  func.func @transform_6(%arg0: i32, %arg1: i32) -> (i32, i32, i32) {
    %c0_i32 = arith.constant 0 : i32
    %c0_i32_0 = arith.constant 0 : i32
    %c0_i32_1 = arith.constant 0 : i32
    return %arg1, %c0_i32, %c0_i32_0 : i32, i32, i32
  }
  func.func @transform_7(%arg0: i32, %arg1: i32) -> (i32, i32, i32) {
    %c0_i32 = arith.constant 0 : i32
    %c0_i32_0 = arith.constant 0 : i32
    %c0_i32_1 = arith.constant 0 : i32
    return %arg1, %c0_i32, %c0_i32_0 : i32, i32, i32
  }
  func.func @transform_8(%arg0: i32, %arg1: i32) -> (i32, i32, i32) {
    %c0_i32 = arith.constant 0 : i32
    %c0_i32_0 = arith.constant 0 : i32
    %c0_i32_1 = arith.constant 0 : i32
    return %arg1, %c0_i32, %c0_i32_0 : i32, i32, i32
  }
  func.func @transform_9(%arg0: i32, %arg1: i32) -> (i32, i32, i32) {
    %c0_i32 = arith.constant 0 : i32
    %c0_i32_0 = arith.constant 0 : i32
    %c0_i32_1 = arith.constant 0 : i32
    return %arg1, %c0_i32, %c0_i32_0 : i32, i32, i32
  }
  func.func @transform_10(%arg0: i32, %arg1: i32) -> (i32, i32, i32) {
    %c0_i32 = arith.constant 0 : i32
    %c0_i32_0 = arith.constant 0 : i32
    %c0_i32_1 = arith.constant 0 : i32
    return %arg1, %c0_i32, %c0_i32_0 : i32, i32, i32
  }
  func.func @transform_11(%arg0: i32, %arg1: i32) -> (i32, i32, i32) {
    %c0_i32 = arith.constant 0 : i32
    %c0_i32_0 = arith.constant 0 : i32
    %c0_i32_1 = arith.constant 0 : i32
    return %arg1, %c0_i32, %c0_i32_0 : i32, i32, i32
  }
  func.func @transform_12(%arg0: i32, %arg1: i32) -> (i32, i32, i32) {
    %c0_i32 = arith.constant 0 : i32
    %c0_i32_0 = arith.constant 0 : i32
    %c0_i32_1 = arith.constant 0 : i32
    return %arg1, %c0_i32, %c0_i32_0 : i32, i32, i32
  }
  func.func @transform_13(%arg0: i32, %arg1: i32) -> (i32, i32, i32) {
    %c0_i32 = arith.constant 0 : i32
    %c0_i32_0 = arith.constant 0 : i32
    %c0_i32_1 = arith.constant 0 : i32
    return %arg1, %c0_i32, %c0_i32_0 : i32, i32, i32
  }
  func.func @transform_14(%arg0: i32, %arg1: i32) -> (i32, i32, i32) {
    %c0_i32 = arith.constant 0 : i32
    %c0_i32_0 = arith.constant 0 : i32
    %c0_i32_1 = arith.constant 0 : i32
    return %arg1, %c0_i32, %c0_i32_0 : i32, i32, i32
  }
  func.func @transform_15(%arg0: i32, %arg1: i32) -> (i32, i32, i32) {
    %c0_i32 = arith.constant 0 : i32
    %c0_i32_0 = arith.constant 0 : i32
    %c0_i32_1 = arith.constant 0 : i32
    return %arg1, %c0_i32, %c0_i32_0 : i32, i32, i32
  }
  func.func @transform_16(%arg0: i32, %arg1: i32) -> (i32, i32, i32) {
    %c0_i32 = arith.constant 0 : i32
    %c0_i32_0 = arith.constant 0 : i32
    %c0_i32_1 = arith.constant 0 : i32
    return %arg1, %c0_i32, %c0_i32_0 : i32, i32, i32
  }
  func.func @transform_17(%arg0: i32, %arg1: i32) -> (i32, i32, i32) {
    %c0_i32 = arith.constant 0 : i32
    %c0_i32_0 = arith.constant 0 : i32
    %c0_i32_1 = arith.constant 0 : i32
    %c0_i32_2 = arith.constant 0 : i32
    return %c0_i32, %c0_i32_0, %c0_i32_1 : i32, i32, i32
  }
  func.func @transform_18(%arg0: i32, %arg1: i32) -> (i32, i32, i32) {
    %c0_i32 = arith.constant 0 : i32
    %c0_i32_0 = arith.constant 0 : i32
    %c0_i32_1 = arith.constant 0 : i32
    %c0_i32_2 = arith.constant 0 : i32
    return %c0_i32, %c0_i32_0, %c0_i32_1 : i32, i32, i32
  }
  func.func @transform_19(%arg0: i32, %arg1: i32) -> (i32, i32, i32) {
    %c0_i32 = arith.constant 0 : i32
    %c0_i32_0 = arith.constant 0 : i32
    %c0_i32_1 = arith.constant 0 : i32
    return %arg0, %c0_i32, %c0_i32_0 : i32, i32, i32
  }
}

</mosaic_0001>

<bundles_post_ra>
// kernel: tpu_custom_call.1
= control target key start
LH: loop header
LB: loop body
LE: loop exit
PB: predicated region body
PF: predicated region fallthrough
CT: control target
= control target key end

     0   :  { %s3052_s0 = inlined_call_operand.vmem [shape: f32[2,8,32], index: 0, kind: input, shape index: {}]   ;;  %s3053_s1 = inlined_call_operand.vmem [shape: bf16[2,32,32], index: 1, kind: input, shape index: {}]   ;;  %s3054_s2 = inlined_call_operand.vmem [shape: f32[2,1,32], index: 2, kind: input, shape index: {}]   ;;  %s3055_s3 = inlined_call_operand.vmem [shape: bf16[2,32,32], index: 3, kind: input, shape index: {}]   ;;  %s3056_s4 = inlined_call_operand.vmem [shape: f32[2,1,32], index: 4, kind: input, shape index: {}]   ;;  %s3057_s5 = inlined_call_operand.vmem [shape: bf16[2,32,32], index: 5, kind: input, shape index: {}]   ;;  %s3058_s6 = inlined_call_operand.vmem [shape: f32[2,1,32], index: 6, kind: input, shape index: {}]   ;;  %s3059_s7 = inlined_call_operand.vmem [shape: bf16[2,32,32], index: 7, kind: input, shape index: {}]   ;;  %s3060_s8 = inlined_call_operand.vmem [shape: f32[2,1,32], index: 8, kind: input, shape index: {}]   ;;  %s3061_s9 = inlined_call_operand.vmem [shape: f32[2,1,32], index: 9, kind: input, shape index: {}]   ;;  %s3062_s10 = inlined_call_operand.vmem [shape: f32[2,1,32], index: 10, kind: input, shape index: {}]   ;;  %s3063_s11 = inlined_call_operand.vmem [shape: f32[2,1,32], index: 11, kind: input, shape index: {}]   ;;  %s3064_s12 = inlined_call_operand.vmem [shape: f32[2,1,32], index: 12, kind: input, shape index: {}]   ;;  %s3065_s13 = inlined_call_operand.vmem [shape: bf16[2,32,256], index: 13, kind: input, shape index: {}]   ;;  %s3066_s14 = inlined_call_operand.vmem [shape: f32[2,1,256], index: 14, kind: input, shape index: {}]   ;;  %s3067_s15 = inlined_call_operand.vmem [shape: bf16[2,256,32], index: 15, kind: input, shape index: {}]   ;;  %s3068_s16 = inlined_call_operand.vmem [shape: f32[2,1,32], index: 16, kind: input, shape index: {}]   ;;  %s3069_s17 = inlined_call_operand.vmem [shape: f32[1,1,32], index: 17, kind: input, shape index: {}]   ;;  %s3070_s18 = inlined_call_operand.vmem [shape: f32[1,1,32], index: 18, kind: input, shape index: {}]   ;;  %s3071_s19 = inlined_call_operand.hbm [shape: f32[2,8,32], index: 19, kind: output, shape index: {}]  }
   0x1   :  { %3076 = sst [smem:[#allocation10_spill]] %s3052_s0 }
   0x2   :  { %3077 = sst [smem:[#allocation11_spill]] %s3053_s1 }
   0x3   :  { %3078 = sst [smem:[#allocation12_spill]] %s3054_s2 }
   0x4   :  { %3079 = sst [smem:[#allocation13_spill]] %s3055_s3 }
   0x5   :  { %3080 = sst [smem:[#allocation14_spill]] %s3056_s4 }
   0x6   :  { %3081 = sst [smem:[#allocation15_spill]] %s3057_s5 }
   0x7   :  { %3082 = sst [smem:[#allocation16_spill]] %s3059_s7 }
   0x8   :  { %3083 = sst [smem:[#allocation17_spill]] %s3065_s13 }
   0x9   :  { %3084 = sst [smem:[#allocation18_spill]] %s3068_s16 }
   0xa   :  { %3085 = sst [smem:[#allocation19_spill]] %s3069_s17 }
   0xb   :  { %3086 = sst [smem:[#allocation20_spill]] %s3070_s18 }
   0xc   :  { %3087 = sst [smem:[#allocation21_spill]] %s3071_s19 }
   0xd   :  { %24 = vsyncpa [#allocation4], 0  ;;  %s2678_s0 = smov 0   ;;  %s2680_s30 = smov 0  }
   0xe   :  { %s2682_s20 = smov 0  }
   0xf LB: > { %3088 = sst [smem:[#allocation6_spill]] %s2561_s0  ;;  %s39_s1 = sadd.s32 1, %s2565_s30  ;;  %s2569_s20 = sphi %s2682_s20, %s30_s20   ;;  %s2565_s30 = sphi %s2680_s30, %s3122_s30   ;;  %s2561_s0 = sphi %s2678_s0, %s3121_s0  }
  0x10   : > { %3089 = sst [smem:[#allocation7_spill]] %s2565_s30  ;;  %p40_p0 = scmp.ge.s32.totalorder %s39_s1, 2 }
  0x11   : > { %3090 = sst [smem:[#allocation8_spill]] %s2569_s20  ;;  %p2228_p1 = scmp.ge.s32.totalorder %s2569_s20, 1 }
  0x12   : > { %p692_p2 = scmp.lt.s32.totalorder %s2569_s20, 3  ;;  %s3124_s1 = smov (%p40_p0, %s39_s1), 0 }
  0x13   : > { %3091 = sst [smem:[#allocation9_spill]] %s3124_s1 }
  0x14   : > { %p693_p3 = pnand %p2228_p1, %p692_p2 }
  0x15   : > { %p810_p4 = scmp.lt.s32.totalorder (!%p693_p3), %s2561_s0, 1  ;;  %s3093_s28 = sld [smem:[#allocation11_spill]] (!%p693_p3) }
  0x16   : > { %696 = sbr.rel (%p693_p3) target bundleno = 2926 (0xb6e), region = 96  ;;  %s3094_s30 = sld [smem:[#allocation13_spill]] (!%p693_p3) }
  0x17   : > { %s3096_s5 = sld [smem:[#allocation15_spill]] (!%p693_p3) }
  0x18   : > { %s3097_s7 = sld [smem:[#allocation16_spill]] (!%p693_p3) }
  0x19   : > { %s3098_s13 = sld [smem:[#allocation17_spill]] (!%p693_p3) }
  0x1a   : > { %s3100_s17 = sld [smem:[#allocation6_spill]] (!%p693_p3) }
  0x1b   : > { %s2701_s22 = scalar_select %p810_p4, %s2561_s0, 1 }
  0x1d   : > { %s2377_s2 = sshll.u32 %s2701_s22, 4  ;;  %s2239_s3 = sshll.u32 %s2701_s22, 1 }
  0x1e   : > { %s2711_s29 = scalar_lea.vmem %s3093_s28, %s2377_s2  ;;  %s2716_s19 = scalar_lea.vmem %s3094_s30, %s2377_s2 }
  0x1f   : > { %s2725_s23 = scalar_lea.vmem %s3096_s5, %s2377_s2  ;;  %s2734_s21 = scalar_lea.vmem %s3097_s7, %s2377_s2 }
  0x20   : > { %s2381_s28 = sshll.u32 %s2701_s22, 5  ;;  %s2766_s16 = scalar_lea.vmem %s3066_s14, %s2239_s3 }
  0x21   : > { %s2760_s1 = scalar_lea.vmem %s3098_s13, %s2381_s28  ;;  %s2382_s0 = sshll.u32 %s2701_s22, 7 }
  0x22   : > { %s2772_s24 = scalar_lea.vmem %s3067_s15, %s2382_s0  ;;  %s3099_s2 = sld [smem:[#allocation18_spill]] }
  0x23   : > { %p2242_p5 = scmp.ne.s32.totalorder %s3100_s17, 0 }
  0x24   : > { %s3101_s30 = sld [smem:[#allocation10_spill]] (!%p2242_p5) }
  0x25   : > { %876 = sbr.rel (%p2242_p5) target bundleno = 45 (0x2d), region = 100 }
  0x28   : > { %s870_s25 = scalar_lea.vmem %s3099_s2, %s2701_s22 }
  0x2a   : > { %s3102_s13 = smov %s3101_s30  ;;  %v877_v0 = vld [vmem:[%s3101_s30] sm:$0xff]  ;;  %vm879_vm0 = vcmask 261120  }
  0x2b   : > { %v878_v1 = vld [vmem:[%s3102_s13 + $0x8] sm:$0xff]  ;;  %880 = vst.msk [vmem:[#allocation2] sm:$0xff] %vm879_vm0, %v877_v0 }
  0x2c   : > { %881 = vst.msk [vmem:[#allocation2 + $0x8] sm:$0xff] %vm879_vm0, %v878_v1 }
  0x2d PF: > { %vm886_vm1 = vcmask 261120   ;;  %v2571_v6 = vmov 32.0   ;;  %v2384_v23 = vld [vmem:[%s2711_s29 + $0x8] sm:$0xff]  ;;  %v2383_v26 = vld [vmem:[%s2711_s29] sm:$0xff]  ;;  %s3104_s2 = scalar_lea.vmem %s3062_s10, %s2701_s22  ;;  %s3105_s4 = sld [smem:[#allocation14_spill]]  ;;  %vm1070_vm7 = vcmask 64512  }
  0x2e   : > { %2455 = vrcp.f32 %v2571_v6  ;;  %v2386_v24 = vld [vmem:[%s2716_s19 + $0x8] sm:$0xff]  ;;  %984 = vmatpush.bf16.msra.mxu0 %v2384_v23  ;;  %v2385_v27 = vld [vmem:[%s2716_s19] sm:$0xff]  ;;  %s3103_s19 = scalar_lea.vmem %s3061_s9, %s2701_s22  ;;  %s3107_s28 = scalar_lea.vmem %s3058_s6, %s2701_s22  ;;  %vm1138_vm8 = vcmask 1043456  }
  0x2f   : > { %v2388_v25 = vld [vmem:[%s2725_s23 + $0x8] sm:$0xff]  ;;  %1018 = vmatpush.bf16.msra.mxu3 %v2386_v24  ;;  %v2387_v28 = vld [vmem:[%s2725_s23] sm:$0xff]  ;;  %s3108_s3 = sld [smem:[#allocation12_spill]]  ;;  %s2572_s17 = smov 120  }
  0x30   : > { %1052 = vmatpush.bf16.msra.mxu2 %v2388_v25  ;;  %v2446_v57 = vld [vmem:[%s3103_s19] ss:$0 sm:$0xff]  ;;  %s2573_s19 = smov 112   ;;  %s2574_s29 = smov 104  }
  0x31   : > { %v2447_v61 = vld [vmem:[%s3104_s2] ss:$0 sm:$0xff]  ;;  %s3110_s20 = scalar_lea.vmem %s3060_s8, %s2701_s22  ;;  %s3111_s0 = scalar_lea.vmem %s3063_s11, %s2701_s22 }
  0x32   : > { %v2785_v2 = vld [vmem:[#allocation2] sm:$0xff]  ;;  %985 = vmatpush.bf16.msra.mxu0 %v2383_v26  ;;  %s3112_s27 = scalar_lea.vmem %s3064_s12, %s2701_s22 }
  0x33   : > { %v887_v3 = vsel %vm886_vm1, %v2785_v2, 0.0  ;;  %v2789_v4 = vld [vmem:[#allocation2 + $0x8] sm:$0xff]  ;;  %1019 = vmatpush.bf16.msra.mxu3 %v2385_v27  ;;  %s3106_s26 = scalar_lea.vmem %s3105_s4, %s2701_s22  ;;  %v2450_v6 = vld [vmem:[%s3107_s28] ss:$0 sm:$0xff]  ;;  %s3114_s28 = sld [smem:[#allocation6_spill]] }
  0x34   : > { %888 = vadd.xlane.f32.xlu0 %v887_v3  ;;  %v890_v5 = vsel %vm886_vm1, %v2789_v4, 0.0  ;;  %v2456_v7 = vpop.eup %2455  ;;  %1053 = vmatpush.bf16.msra.mxu2 %v2387_v28 }
  0x35   : > { %v894_v8 = vmul.f32 32.0, %v2456_v7  ;;  %vm898_vm2 = vweird.f32 %v2456_v7  ;;  %s3109_s5 = scalar_lea.vmem %s3108_s3, %s2701_s22 }
  0x37   : > { %v895_v9 = vsub.f32 1.0, %v894_v8 }
  0x39   : > { %v896_v10 = vmul.f32 %v2456_v7, %v895_v9  ;;  %p2372_p6 = scmp.ne.s32.totalorder %s3114_s28, 1 }
  0x3a   : > { %s3115_s30 = sld [smem:[#allocation19_spill]] (!%p2372_p6) }
  0x3b   : > { %v897_v11 = vadd.f32 %v2456_v7, %v896_v10 }
  0x3c   : > { %891 = vadd.xlane.f32.xlu0 %v890_v5  ;;  %v2449_v5 = vld [vmem:[%s3106_s26] ss:$0 sm:$0xff] }
  0x3d   : > { %v2793_v12 = vsel %vm898_vm2, %v2456_v7, %v897_v11  ;;  %v2448_v7 = vld [vmem:[%s3109_s5] ss:$0 sm:$0xff]  ;;  %s3116_s5 = sld [smem:[#allocation20_spill]] (!%p2372_p6) }
  0xa7   : > { %v889_v13 = vpop.xlane.xlu0 %888 }
  0xa8   : > { %v900_v14 = vmul.f32 %v2793_v12, %v889_v13 }
  0xaa   : > { %v902_v15 = vsub.f32 %v2785_v2, %v900_v14 }
  0xac   : > { %v904_v16 = vmul.f32 %v902_v15, %v902_v15 }
  0xae   : > { %v906_v17 = vsel %vm886_vm1, %v904_v16, 0.0 }
  0xaf   : > { %907 = vadd.xlane.f32.xlu1 %v906_v17  ;;  %v892_v18 = vpop.xlane.xlu0 %891 }
  0xb0   : > { %v901_v19 = vmul.f32 %v2793_v12, %v892_v18 }
  0xb2   : > { %v903_v20 = vsub.f32 %v2789_v4, %v901_v19 }
  0xb4   : > { %v905_v21 = vmul.f32 %v903_v20, %v903_v20 }
  0xb6   : > { %v909_v22 = vsel %vm886_vm1, %v905_v21, 0.0 }
  0xb7   : > { %910 = vadd.xlane.f32.xlu1 %v909_v22 }
 0x122   : > { %v908_v29 = vpop.xlane.xlu1 %907 }
 0x123   : > { %v912_v30 = vmul.f32 0.032258064, %v908_v29 }
 0x125   : > { %2457 = vrsqrt.f32 %v912_v30  ;;  %vm921_vm3 = vcmp.eq.f32.partialorder %v912_v30, inf  ;;  %v924_v43 = vand.u32 2147483648, %v912_v30  ;;  %vm923_vm4 = vcmp.eq.f32.partialorder %v912_v30, 0.0 }
 0x12a   : > { %v911_v31 = vpop.xlane.xlu1 %910 }
 0x12b   : > { %v2458_v32 = vpop.eup %2457  ;;  %v913_v33 = vmul.f32 0.032258064, %v911_v31 }
 0x12c   : > { %v915_v34 = vmul.f32 %v2458_v32, %v912_v30 }
 0x12d   : > { %2459 = vrsqrt.f32 %v913_v33  ;;  %vm933_vm5 = vcmp.eq.f32.partialorder %v913_v33, inf  ;;  %v936_v51 = vand.u32 2147483648, %v913_v33  ;;  %vm935_vm6 = vcmp.eq.f32.partialorder %v913_v33, 0.0 }
 0x12e   : > { %v916_v35 = vmul.f32 %v2458_v32, %v915_v34 }
 0x130   : > { %v917_v36 = vmul.f32 0.5, %v916_v35 }
 0x132   : > { %v918_v37 = vsub.f32 1.5, %v917_v36 }
 0x133   : > { %v2460_v38 = vpop.eup %2459 }
 0x134   : > { %v927_v39 = vmul.f32 %v2460_v38, %v913_v33  ;;  %v919_v40 = vmul.f32 %v2458_v32, %v918_v37 }
 0x136   : > { %v928_v41 = vmul.f32 %v2460_v38, %v927_v39  ;;  %v920_v42 = vmul.f32 %v919_v40, %v912_v30 }
 0x138   : > { %v929_v44 = vmul.f32 0.5, %v928_v41  ;;  %v922_v45 = vsel %vm921_vm3, %v912_v30, %v920_v42 }
 0x139   : > { %v925_v46 = vsel %vm923_vm4, %v924_v43, %v922_v45 }
 0x13a   : > { %v930_v47 = vsub.f32 1.5, %v929_v44  ;;  %v938_v48 = vadd.f32 1e-06, %v925_v46 }
 0x13c   : > { %v931_v49 = vmul.f32 %v2460_v38, %v930_v47  ;;  %2461 = vrcp.f32 %v938_v48 }
 0x13e   : > { %v932_v50 = vmul.f32 %v931_v49, %v913_v33 }
 0x140   : > { %v934_v52 = vsel %vm933_vm5, %v913_v33, %v932_v50 }
 0x141   : > { %v937_v53 = vsel %vm935_vm6, %v936_v51, %v934_v52 }
 0x142   : > { %v939_v54 = vadd.f32 1e-06, %v937_v53  ;;  %v2462_v55 = vpop.eup %2461 }
 0x143   : > { %v942_v56 = vmul.f32 %v2462_v55, %v902_v15 }
 0x144   : > { %2463 = vrcp.f32 %v939_v54 }
 0x145   : > { %v947_v60 = vmul.f32 %v2446_v57, %v942_v56 }
 0x147   : > { %v952_v63 = vadd.f32 %v2447_v61, %v947_v60 }
 0x14a   : > { %v2464_v58 = vpop.eup %2463 }
 0x14b   : > { %v943_v59 = vmul.f32 %v2464_v58, %v903_v20 }
 0x14d   : > { %v948_v62 = vmul.f32 %v2446_v57, %v943_v59 }
 0x14f   : > { %v953_v0 = vadd.f32 %v2447_v61, %v948_v62 }
 0x151   : > { %v954_v1 = vpack.c.bf16 %v953_v0, %v952_v63 }
 0x153   : > { %2251 = vmatmul.msk.bf16.vlgmr.msra.gmra.mxu0 %vm886_vm1, %v954_v1  ;;  %2260 = vmatmul.msk.bf16.vlgmr.msra.gmra.mxu3 %vm886_vm1, %v954_v1 }
 0x154   : > { %2269 = vmatmul.msk.bf16.vlgmr.msra.gmra.mxu2 %vm886_vm1, %v954_v1 }
 0x1d0   : > { %v987_v3 = vpop.f32.mrf.mxu0 }
 0x1d1   : > { %v988_v14 = vadd.f32 %v2448_v7, %v987_v3 }
 0x1d3   : > { %v1060_v22 = vpack.c.bf16 %v988_v14, %v988_v14 }
 0x1d5   : > { %v1176_v30 = vunpack.c.l.b16 %v1060_v22 }
 0x1d6   : > { %v1021_v8 = vpop.f32.mrf.mxu3 }
 0x1d7   : > { %v1022_v9 = vadd.f32 %v2449_v5, %v1021_v8  ;;  %v1055_v10 = vpop.f32.mrf.mxu2  ;;  %v2848_v36 = vpack.c.b16 %v1176_v30, %v1176_v30 }
 0x1d8   : > { %v1056_v11 = vadd.f32 %v2450_v6, %v1055_v10  ;;  %v989_v13 = vpop.f32.mrf.mxu0 }
 0x1d9   : > { %v1062_v15 = vpack.c.bf16 %v1022_v9, %v1022_v9  ;;  %v990_v16 = vadd.f32 %v2448_v7, %v989_v13 }
 0x1da   : > { %v1064_v17 = vpack.c.bf16 %v1056_v11, %v1056_v11 }
 0x1db   : > { %v1181_v18 = vunpack.c.l.b16 %v1062_v15  ;;  %v1061_v19 = vpack.c.bf16 %v990_v16, %v990_v16  ;;  %v1075_v20 = vsel %vm1070_vm7, %v1062_v15, 0 }
 0x1dc   : > { %1084 = vmatpush.bf16.xpose.msrb.mxu3 %v1075_v20  ;;  %v1140_v21 = vsel %vm1138_vm8, %v1064_v17, 0  ;;  %v1260_v52 = vunpack.c.l.b16 %v1064_v17 }
 0x1dd   : > { %v2837_v23 = vpack.c.b16 %v1181_v18, %v1181_v18  ;;  %v1205_v24 = vunpack.c.l.b16 %v1061_v19  ;;  %1149 = vmatpush.bf16.msra.mxu1 %v1140_v21 }
 0x1de   : > { %v1023_v25 = vpop.f32.mrf.mxu3  ;;  %v2863_v53 = vpack.c.b16 %v1260_v52, %v1260_v52 }
 0x1df   : > { %v2839_v26 = vpack.c.b16 %v1205_v24, %v1205_v24  ;;  %v1024_v27 = vadd.f32 %v2449_v5, %v1023_v25  ;;  %v1057_v28 = vpop.f32.mrf.mxu2  ;;  %1183 = vrot.lane.b32.xlu2 %v2837_v23, %s2572_s17 }
 0x1e0   : > { %v1058_v29 = vadd.f32 %v2450_v6, %v1057_v28 }
 0x1e1   : > { %v1063_v31 = vpack.c.bf16 %v1024_v27, %v1024_v27  ;;  %1207 = vrot.lane.b32.xlu1 %v2839_v26, %s2572_s17 }
 0x1e2   : > { %v1065_v32 = vpack.c.bf16 %v1058_v29, %v1058_v29 }
 0x1e3   : > { %v1210_v33 = vunpack.c.l.b16 %v1063_v31  ;;  %2270 = vmatmul.msk.bf16.vlgmr.msrb.gmra.mxu3 %vm1070_vm7, %v1060_v22  ;;  %v1094_v34 = vsel %vm1070_vm7, %v1063_v31, 0 }
 0x1e4   : > { %1103 = vmatpush.bf16.xpose.msrb.mxu0 %v1094_v34  ;;  %v1159_v35 = vsel %vm1138_vm8, %v1065_v32, 0  ;;  %v1284_v3 = vunpack.c.l.b16 %v1065_v32 }
 0x1e5   : > { %v2850_v37 = vpack.c.b16 %v1210_v33, %v1210_v33  ;;  %1168 = vmatpush.bf16.msrb.mxu1 %v1159_v35 }
 0x1e6   : > { %v2871_v8 = vpack.c.b16 %v1284_v3, %v1284_v3 }
 0x1e7   : > { %1212 = vrot.lane.b32.xlu0 %v2850_v37, %s2572_s17  ;;  %1178 = vrot.lane.b32.xlu2 %v2848_v36, %s2572_s17 }
 0x1eb   : > { %2271 = vmatmul.msk.bf16.vlgmr.msrb.gmra.mxu0 %vm1070_vm7, %v1061_v19 }
 0x239   : > { %v1184_v38 = vpop.permute.xlu2 %1183 }
 0x23a   : > { %v1189_v39 = vsel %vm1070_vm7, %v1184_v38, 0 }
 0x23b   : > { %1198 = vmatpush.bf16.xpose.msra.mxu3 %v1189_v39 }
 0x241   : > { %v1179_v40 = vpop.permute.xlu2 %1178 }
 0x242   : > { %2274 = vmatmul.msk.bf16.vlgmr.msra.gmra.mxu3 %vm1070_vm7, %v1179_v40 }
 0x253   : > { %v1208_v43 = vpop.permute.xlu1 %1207 }
 0x259   : > { %v1213_v41 = vpop.permute.xlu0 %1212 }
 0x25a   : > { %v1218_v42 = vsel %vm1070_vm7, %v1213_v41, 0 }
 0x25b   : > { %1227 = vmatpush.bf16.xpose.msra.mxu0 %v1218_v42 }
 0x262   : > { %2275 = vmatmul.msk.bf16.vlgmr.msra.gmra.mxu0 %vm1070_vm7, %v1208_v43 }
 0x266   : > { %v1086_v44 = vpop.f32.mrf.mxu3 }
 0x267   : > { %v1109_v45 = vmul.f32 0.35355338, %v1086_v44 }
 0x268   : > { %v1105_v46 = vpop.f32.mrf.mxu0 }
 0x269   : > { %v1110_v47 = vmul.f32 0.35355338, %v1105_v46  ;;  %v1111_v48 = vsel %vm1070_vm7, %v1109_v45, -inf }
 0x26a   : > { %1112 = vmax.xlane.f32.xlu2 %v1111_v48 }
 0x26b   : > { %v1114_v49 = vsel %vm1070_vm7, %v1110_v47, -inf }
 0x26c   : > { %1115 = vmax.xlane.f32.xlu0 %v1114_v49  ;;  %v1067_v49 = vld [vmem:[%s2734_s21 + $0x4] sm:$0xf] }
 0x26e   : > { %v1088_v50 = vpop.f32.mrf.mxu3 }
 0x270   : > { %v1107_v51 = vpop.f32.mrf.mxu0 }
 0x280   : > { %1262 = vrot.lane.b32.xlu0 %v2863_v53, %s2572_s17 }
 0x2c5   : > { %v1200_v54 = vpop.f32.mrf.mxu3 }
 0x2c6   : > { %v1233_v55 = vmul.f32 0.35355338, %v1200_v54 }
 0x2c8   : > { %v1235_v56 = vsel %vm1070_vm7, %v1233_v55, -inf }
 0x2c9   : > { %1236 = vmax.xlane.f32.xlu1 %v1235_v56 }
 0x2cd   : > { %v1202_v57 = vpop.f32.mrf.mxu3 }
 0x2dd   : > { %v1113_v58 = vpop.xlane.xlu2 %1112 }
 0x2de   : > { %v1117_v59 = vsub.f32 %v1109_v45, %v1113_v58 }
 0x2df   : > { %v1116_v60 = vpop.xlane.xlu0 %1115  ;;  %v1229_v61 = vpop.f32.mrf.mxu0 }
 0x2e0   : > { %v1119_v62 = vmul.f32 1.442695, %v1117_v59  ;;  %v1118_v63 = vsub.f32 %v1110_v47, %v1116_v60  ;;  %v1234_v0 = vmul.f32 0.35355338, %v1229_v61  ;;  %v1066_v47 = vld [vmem:[%s2734_s21] sm:$0xf] }
 0x2e1   : > { %v1332_v48 = vsel %vm1138_vm8, %v1066_v47, 0 }
 0x2e2   : > { %2465 = vpow2.f32 %v1119_v62  ;;  %1348 = vrot.lane.b32.xlu1 %v2848_v36, %s2573_s19  ;;  %v1238_v1 = vsel %vm1070_vm7, %v1234_v0, -inf  ;;  %v1121_v5 = vmul.f32 1.442695, %v1118_v63  ;;  %1341 = vmatpush.bf16.msrb.mxu0 %v1332_v48 }
 0x2e3   : > { %1239 = vmax.xlane.f32.xlu0 %v1238_v1 }
 0x2e4   : > { %2467 = vpow2.f32 %v1121_v5 }
 0x2e7   : > { %v1231_v6 = vpop.f32.mrf.mxu0 }
 0x2e8   : > { %v2466_v7 = vpop.eup %2465 }
 0x2e9   : > { %v1123_v9 = vsel %vm1070_vm7, %v2466_v7, 0.0 }
 0x2ea   : > { %1124 = vadd.xlane.f32.xlu2 %v1123_v9  ;;  %1286 = vrot.lane.b32.xlu1 %v2871_v8, %s2572_s17  ;;  %v2468_v10 = vpop.eup %2467 }
 0x2eb   : > { %v1126_v11 = vsel %vm1070_vm7, %v2468_v10, 0.0 }
 0x2f2   : > { %1127 = vadd.xlane.f32.xlu2 %v1126_v11  ;;  %1373 = vrot.lane.b32.xlu1 %v2850_v37, %s2573_s19  ;;  %v1263_v28 = vpop.permute.xlu0 %1262 }
 0x2f3   : > { %v1268_v31 = vsel %vm1138_vm8, %v1263_v28, 0 }
 0x2f7   : > { %1487 = vrot.lane.b32.xlu0 %v2837_v23, %s2574_s29 }
 0x2fa   : > { %1371 = vrot.lane.b32.xlu1 %v2839_v26, %s2573_s19 }
 0x33c   : > { %v1237_v13 = vpop.xlane.xlu1 %1236 }
 0x33d   : > { %v1241_v14 = vsub.f32 %v1233_v55, %v1237_v13 }
 0x33f   : > { %v1243_v15 = vmul.f32 1.442695, %v1241_v14 }
 0x341   : > { %2469 = vpow2.f32 %v1243_v15 }
 0x347   : > { %v2470_v16 = vpop.eup %2469 }
 0x348   : > { %v1247_v17 = vsel %vm1070_vm7, %v2470_v16, 0.0 }
 0x349   : > { %1248 = vadd.xlane.f32.xlu2 %v1247_v17 }
 0x354   : > { %v1349_v18 = vpop.permute.xlu1 %1348 }
 0x356   : > { %v1240_v34 = vpop.xlane.xlu0 %1239 }
 0x35c   : > { %v1287_v19 = vpop.permute.xlu1 %1286 }
 0x35d   : > { %v1125_v20 = vpop.xlane.xlu2 %1124  ;;  %v1292_v21 = vsel %vm1138_vm8, %v1287_v19, 0 }
 0x35e   : > { %2471 = vrcp.f32 %v1125_v20  ;;  %1301 = vmatpush.bf16.msrb.mxu2 %v1292_v21 }
 0x361   : > { %1350 = vrot.lane.b32.xlu2 %v2837_v23, %s2573_s19  ;;  %v1242_v23 = vsub.f32 %v1234_v0, %v1240_v34 }
 0x363   : > { %v1245_v38 = vmul.f32 1.442695, %v1242_v23 }
 0x364   : > { %v2472_v22 = vpop.eup %2471  ;;  %v1374_v24 = vpop.permute.xlu1 %1373 }
 0x365   : > { %v1379_v25 = vsel %vm1070_vm7, %v1374_v24, 0  ;;  %v1131_v27 = vmul.f32 %v2472_v22, %v2466_v7  ;;  %v1128_v29 = vpop.xlane.xlu2 %1127 }
 0x366   : > { %1388 = vmatpush.bf16.xpose.msra.mxu2 %v1379_v25  ;;  %2473 = vrcp.f32 %v1128_v29 }
 0x367   : > { %v1133_v30 = vpack.c.bf16 %v1131_v27, %v1131_v27  ;;  %2475 = vpow2.f32 %v1245_v38 }
 0x369   : > { %2272 = vmatmul.msk.bf16.vlgmr.msra.gmra.mxu1 %vm1070_vm7, %v1133_v30  ;;  %v1488_v60 = vpop.permute.xlu0 %1487 }
 0x36a   : > { %1277 = vmatpush.bf16.msra.mxu1 %v1268_v31  ;;  %v1493_v63 = vsel %vm1070_vm7, %v1488_v60, 0 }
 0x36c   : > { %v2474_v32 = vpop.eup %2473  ;;  %v1372_v0 = vpop.permute.xlu1 %1371 }
 0x36d   : > { %v1132_v33 = vmul.f32 %v2474_v32, %v2468_v10  ;;  %v2476_v39 = vpop.eup %2475 }
 0x36e   : > { %v1250_v40 = vsel %vm1070_vm7, %v2476_v39, 0.0 }
 0x36f   : > { %v1134_v35 = vpack.c.bf16 %v1132_v33, %v1132_v33 }
 0x379   : > { %2273 = vmatmul.msk.bf16.vlgmr.msrb.gmra.mxu1 %vm1070_vm7, %v1134_v35 }
 0x38a   : > { %1251 = vadd.xlane.f32.xlu2 %v1250_v40 }
 0x3a2   : > { %1420 = vrot.lane.b32.xlu2 %v2863_v53, %s2573_s19 }
 0x3aa   : > { %1485 = vrot.lane.b32.xlu2 %v2848_v36, %s2574_s29  ;;  %v1312_v36 = vsel %vm1138_vm8, %v1067_v49, 0 }
 0x3ab   : > { %1321 = vmatpush.bf16.msrb.mxu3 %v1312_v36 }
 0x3bc   : > { %v1249_v41 = vpop.xlane.xlu2 %1248 }
 0x3bd   : > { %2477 = vrcp.f32 %v1249_v41 }
 0x3c3   : > { %v2478_v42 = vpop.eup %2477 }
 0x3c4   : > { %v1255_v43 = vmul.f32 %v2478_v42, %v2470_v16  ;;  %v1351_v44 = vpop.permute.xlu2 %1350 }
 0x3c5   : > { %v1356_v45 = vsel %vm1070_vm7, %v1351_v44, 0 }
 0x3c6   : > { %v1257_v46 = vpack.c.bf16 %v1255_v43, %v1255_v43  ;;  %1365 = vmatpush.bf16.xpose.msrb.mxu1 %v1356_v45 }
 0x3c8   : > { %2276 = vmatmul.msk.bf16.vlgmr.msra.gmra.mxu1 %vm1070_vm7, %v1257_v46 }
 0x3d8   : > { %2280 = vmatmul.msk.bf16.vlgmr.msrb.gmra.mxu1 %vm1070_vm7, %v1349_v18 }
 0x3e6   : > { %v1151_v50 = vpop.f32.mrf.mxu1 }
 0x3ee   : > { %v1153_v51 = vpop.f32.mrf.mxu1 }
 0x3f6   : > { %v1170_v52 = vpop.f32.mrf.mxu1 }
 0x3f7   : > { %v1174_v54 = vpack.c.bf16 %v1170_v52, %v1151_v50 }
 0x3f9   : > { %2279 = vmatmul.msk.bf16.vlgmr.msrb.gmra.mxu0 %vm1070_vm7, %v1174_v54 }
 0x3fd   : > { %v1252_v55 = vpop.xlane.xlu2 %1251 }
 0x3fe   : > { %2479 = vrcp.f32 %v1252_v55  ;;  %v1172_v56 = vpop.f32.mrf.mxu1 }
 0x404   : > { %v2480_v57 = vpop.eup %2479 }
 0x405   : > { %v1256_v58 = vmul.f32 %v2480_v57, %v2476_v39  ;;  %v1421_v59 = vpop.permute.xlu2 %1420 }
 0x406   : > { %v1426_v61 = vsel %vm1138_vm8, %v1421_v59, 0 }
 0x407   : > { %1435 = vmatpush.bf16.msra.mxu3 %v1426_v61  ;;  %v1258_v62 = vpack.c.bf16 %v1256_v58, %v1256_v58 }
 0x409   : > { %2277 = vmatmul.msk.bf16.vlgmr.msrb.gmra.mxu2 %vm1070_vm7, %v1258_v62 }
 0x40a   : > { %1502 = vmatpush.bf16.xpose.msrb.mxu2 %v1493_v63 }
 0x40d   : > { %v1486_v1 = vpop.permute.xlu2 %1485 }
 0x419   : > { %2281 = vmatmul.msk.bf16.vlgmr.msra.gmra.mxu2 %vm1070_vm7, %v1372_v0 }
 0x429   : > { %2285 = vmatmul.msk.bf16.vlgmr.msrb.gmra.mxu2 %vm1070_vm7, %v1486_v1 }
 0x445   : > { %v1279_v3 = vpop.f32.mrf.mxu1 }
 0x44d   : > { %v1281_v5 = vpop.f32.mrf.mxu1 }
 0x455   : > { %v1367_v6 = vpop.f32.mrf.mxu1 }
 0x456   : > { %v1394_v7 = vmul.f32 0.35355338, %v1367_v6 }
 0x458   : > { %v1396_v9 = vsel %vm1070_vm7, %v1394_v7, -inf }
 0x459   : > { %1397 = vmax.xlane.f32.xlu1 %v1396_v9  ;;  %v1068_v9 = vld [vmem:[%s2734_s21 + $0x8] sm:$0xf] }
 0x45d   : > { %v1369_v10 = vpop.f32.mrf.mxu1 }
 0x45e   : > { %v1467_v10 = vsel %vm1138_vm8, %v1068_v9, 0 }
 0x45f   : > { %1476 = vmatpush.bf16.msra.mxu1 %v1467_v10 }
 0x472   : > { %1508 = vrot.lane.b32.xlu1 %v2839_v26, %s2574_s29 }
 0x47a   : > { %1441 = vrot.lane.b32.xlu1 %v2871_v8, %s2573_s19 }
 0x48c   : > { %v1303_v11 = vpop.f32.mrf.mxu2 }
 0x48d   : > { %v1307_v13 = vpack.c.bf16 %v1303_v11, %v1279_v3  ;;  %v1343_v11 = vpop.f32.mrf.mxu0 }
 0x48f   : > { %2278 = vmatmul.msk.bf16.vlgmr.msrb.gmra.mxu3 %vm1070_vm7, %v1307_v13 }
 0x494   : > { %v1305_v14 = vpop.f32.mrf.mxu2 }
 0x495   : > { %v1345_v13 = vpop.f32.mrf.mxu0 }
 0x49c   : > { %v1390_v15 = vpop.f32.mrf.mxu2 }
 0x49d   : > { %v1395_v30 = vmul.f32 0.35355338, %v1390_v15 }
 0x49f   : > { %v1399_v31 = vsel %vm1070_vm7, %v1395_v30, -inf }
 0x4a4   : > { %v1392_v16 = vpop.f32.mrf.mxu2 }
 0x4ac   : > { %v1504_v17 = vpop.f32.mrf.mxu2 }
 0x4ad   : > { %v1531_v18 = vmul.f32 0.35355338, %v1504_v17 }
 0x4af   : > { %v1533_v19 = vsel %vm1070_vm7, %v1531_v18, -inf }
 0x4b0   : > { %1534 = vmax.xlane.f32.xlu1 %v1533_v19 }
 0x4b4   : > { %v1506_v20 = vpop.f32.mrf.mxu2 }
 0x4cc   : > { %v1398_v21 = vpop.xlane.xlu1 %1397 }
 0x4cd   : > { %v1402_v22 = vsub.f32 %v1394_v7, %v1398_v21 }
 0x4cf   : > { %v1404_v24 = vmul.f32 1.442695, %v1402_v22 }
 0x4d1   : > { %2481 = vpow2.f32 %v1404_v24 }
 0x4d7   : > { %v2482_v26 = vpop.eup %2481 }
 0x4d8   : > { %v1408_v25 = vsel %vm1070_vm7, %v2482_v26, 0.0 }
 0x4d9   : > { %1409 = vadd.xlane.f32.xlu0 %v1408_v25 }
 0x4e4   : > { %v1509_v27 = vpop.permute.xlu1 %1508 }
 0x4ec   : > { %v1442_v28 = vpop.permute.xlu1 %1441 }
 0x4ed   : > { %v1447_v29 = vsel %vm1138_vm8, %v1442_v28, 0  ;;  %1510 = vrot.lane.b32.xlu0 %v2850_v37, %s2574_s29  ;;  %v1069_v28 = vld [vmem:[%s2734_s21 + $0xc] sm:$0xf] }
 0x4ee   : > { %1456 = vmatpush.bf16.msra.mxu0 %v1447_v29  ;;  %v1604_v29 = vsel %vm1138_vm8, %v1069_v28, 0  ;;  %v2406_v28 = vld [vmem:[%s2772_s24 + $0x68] sm:$0xff] }
 0x4ef   : > { %1613 = vmatpush.bf16.msra.mxu2 %v1604_v29  ;;  %v2398_v29 = vld [vmem:[%s2772_s24 + $0x28] sm:$0xff] }
 0x512   : > { %v1323_v48 = vpop.f32.mrf.mxu3 }
 0x517   : > { %1400 = vmax.xlane.f32.xlu0 %v1399_v31 }
 0x51a   : > { %v2928_v49 = vpop.f32.mrf.mxu3 }
 0x523   : > { %v1535_v39 = vpop.xlane.xlu1 %1534 }
 0x524   : > { %v1539_v41 = vsub.f32 %v1531_v18, %v1535_v39  ;;  %v1346_v39 = vadd.f32 %v1345_v13, %v2928_v49 }
 0x526   : > { %v1541_v43 = vmul.f32 1.442695, %v1539_v41 }
 0x54c   : > { %v1410_v32 = vpop.xlane.xlu0 %1409 }
 0x54d   : > { %2483 = vrcp.f32 %v1410_v32 }
 0x553   : > { %v2484_v33 = vpop.eup %2483 }
 0x554   : > { %v1416_v34 = vmul.f32 %v2484_v33, %v2482_v26 }
 0x556   : > { %v1418_v35 = vpack.c.bf16 %v1416_v34, %v1416_v34 }
 0x558   : > { %2282 = vmatmul.msk.bf16.vlgmr.msra.gmra.mxu3 %vm1070_vm7, %v1418_v35 }
 0x55f   : > { %v1511_v23 = vpop.permute.xlu0 %1510 }
 0x560   : > { %v1516_v38 = vsel %vm1070_vm7, %v1511_v23, 0  ;;  %v2451_v23 = vld [vmem:[%s3110_s20] ss:$0 sm:$0xff] }
 0x561   : > { %1525 = vmatpush.bf16.xpose.msrb.mxu3 %v1516_v38 }
 0x568   : > { %2286 = vmatmul.msk.bf16.vlgmr.msrb.gmra.mxu3 %vm1070_vm7, %v1509_v27 }
 0x58a   : > { %v1401_v37 = vpop.xlane.xlu0 %1400 }
 0x58b   : > { %v1403_v40 = vsub.f32 %v1395_v30, %v1401_v37 }
 0x58d   : > { %v1406_v42 = vmul.f32 1.442695, %v1403_v40 }
 0x58f   : > { %2485 = vpow2.f32 %v1406_v42 }
 0x590   : > { %2487 = vpow2.f32 %v1541_v43 }
 0x595   : > { %v2486_v44 = vpop.eup %2485 }
 0x596   : > { %v1411_v45 = vsel %vm1070_vm7, %v2486_v44, 0.0  ;;  %v2488_v46 = vpop.eup %2487 }
 0x597   : > { %1412 = vadd.xlane.f32.xlu2 %v1411_v45  ;;  %v1545_v47 = vsel %vm1070_vm7, %v2488_v46, 0.0 }
 0x59f   : > { %1546 = vadd.xlane.f32.xlu2 %v1545_v47 }
 0x5b7   : > { %1557 = vrot.lane.b32.xlu2 %v2863_v53, %s2574_s29 }
 0x5db   : > { %v1437_v50 = vpop.f32.mrf.mxu3 }
 0x5e3   : > { %v1439_v36 = vpop.f32.mrf.mxu3 }
 0x5eb   : > { %v1527_v51 = vpop.f32.mrf.mxu3 }
 0x5ec   : > { %v1532_v52 = vmul.f32 0.35355338, %v1527_v51 }
 0x5ee   : > { %v1536_v54 = vsel %vm1070_vm7, %v1532_v52, -inf }
 0x5ef   : > { %1537 = vmax.xlane.f32.xlu0 %v1536_v54 }
 0x5f3   : > { %v1529_v55 = vpop.f32.mrf.mxu3 }
 0x5f4   : > { %v2300_v55 = vld [vmem:[%s2760_s1 + $0x10] sm:$0xf] }
 0x60a   : > { %v1413_v56 = vpop.xlane.xlu2 %1412 }
 0x60b   : > { %2489 = vrcp.f32 %v1413_v56  ;;  %v2392_v56 = vld [vmem:[%s2760_s1 + $0x14] sm:$0xf0] }
 0x611   : > { %v2490_v57 = vpop.eup %2489 }
 0x612   : > { %v1417_v58 = vmul.f32 %v2490_v57, %v2486_v44  ;;  %v1547_v59 = vpop.xlane.xlu2 %1546  ;;  %v2391_v57 = vld [vmem:[%s2760_s1 + $0x14] sm:$0xf] }
 0x613   : > { %2491 = vrcp.f32 %v1547_v59  ;;  %v2302_v59 = vld [vmem:[%s2760_s1 + $0x18] sm:$0xf0] }
 0x614   : > { %v1419_v60 = vpack.c.bf16 %v1417_v58, %v1417_v58  ;;  %v2301_v58 = vor.u32 %v2392_v56, %v2300_v55  ;;  %v2395_v55 = vld [vmem:[%s2772_s24 + $0x10] sm:$0xff]  ;;  %v2401_v56 = vld [vmem:[%s2772_s24 + $0x40] sm:$0xff] }
 0x616   : > { %2283 = vmatmul.msk.bf16.vlgmr.msra.gmra.mxu0 %vm1070_vm7, %v1419_v60  ;;  %v2292_v60 = vld [vmem:[%s2760_s1] sm:$0xf]  ;;  %1732 = vmatpush.bf16.msra.mxu3 %v2301_v58 }
 0x617   : > { %v2393_v58 = vld [vmem:[%s2772_s24] sm:$0xff] }
 0x619   : > { %v2492_v62 = vpop.eup %2491 }
 0x61a   : > { %v1558_v53 = vpop.permute.xlu2 %1557  ;;  %v1553_v63 = vmul.f32 %v2492_v62, %v2488_v46  ;;  %v2305_v62 = vor.u32 %v2391_v57, %v2302_v59  ;;  %v2394_v57 = vld [vmem:[%s2772_s24 + $0x8] sm:$0xff]  ;;  %v1697_v59 = vld [vmem:[%s2766_s16] sm:$0x3] }
 0x61b   : > { %v1563_v61 = vsel %vm1138_vm8, %v1558_v53, 0  ;;  %v2390_v53 = vld [vmem:[%s2760_s1 + $0x4] sm:$0xf0] }
 0x61c   : > { %1572 = vmatpush.bf16.msrb.mxu0 %v1563_v61  ;;  %v1555_v0 = vpack.c.bf16 %v1553_v63, %v1553_v63  ;;  %v2389_v63 = vld [vmem:[%s2760_s1 + $0x4] sm:$0xf] }
 0x620   : > { %1746 = vmatpush.bf16.msra.mxu0 %v2305_v62 }
 0x626   : > { %2287 = vmatmul.msk.bf16.vlgmr.msrb.gmra.mxu0 %vm1070_vm7, %v1555_v0  ;;  %v2294_v0 = vld [vmem:[%s2760_s1 + $0x8] sm:$0xf0] }
 0x662   : > { %v1538_v1 = vpop.xlane.xlu0 %1537 }
 0x663   : > { %v1540_v3 = vsub.f32 %v1532_v52, %v1538_v1 }
 0x665   : > { %v1543_v5 = vmul.f32 1.442695, %v1540_v3  ;;  %v2293_v3 = vor.u32 %v2390_v53, %v2292_v60  ;;  %v1700_v53 = vperm.slane %v1697_v59, 1 }
 0x667   : > { %2493 = vpow2.f32 %v1543_v5  ;;  %v2297_v5 = vor.u32 %v2389_v63, %v2294_v0  ;;  %1733 = vmatpush.bf16.msra.mxu3 %v2293_v3  ;;  %v1699_v0 = vperm.slane %v1697_v59, 0 }
 0x669   : > { %1747 = vmatpush.bf16.msra.mxu0 %v2297_v5 }
 0x66d   : > { %v2494_v6 = vpop.eup %2493 }
 0x66e   : > { %v1548_v7 = vsel %vm1070_vm7, %v2494_v6, 0.0 }
 0x66f   : > { %1549 = vadd.xlane.f32.xlu0 %v1548_v7 }
 0x683   : > { %1578 = vrot.lane.b32.xlu0 %v2871_v8, %s2574_s29  ;;  %v1344_v8 = vadd.f32 %v1343_v11, %v1323_v48 }
 0x693   : > { %v1458_v14 = vpop.f32.mrf.mxu0 }
 0x694   : > { %v1462_v15 = vpack.c.bf16 %v1458_v14, %v1437_v50 }
 0x696   : > { %2284 = vmatmul.msk.bf16.vlgmr.msra.gmra.mxu1 %vm1070_vm7, %v1462_v15 }
 0x69b   : > { %v1460_v16 = vpop.f32.mrf.mxu0 }
 0x69c   : > { %v2408_v16 = vld [vmem:[%s2772_s24 + $0x78] sm:$0xff] }
 0x69d   : > { %1906 = vmatpush.bf16.msrb.mxu2 %v2408_v16 }
 0x6a3   : > { %v1574_v17 = vpop.f32.mrf.mxu0 }
 0x6ab   : > { %v1576_v18 = vpop.f32.mrf.mxu0 }
 0x6e2   : > { %v1550_v19 = vpop.xlane.xlu0 %1549 }
 0x6e3   : > { %2495 = vrcp.f32 %v1550_v19 }
 0x6e9   : > { %v2496_v20 = vpop.eup %2495 }
 0x6ea   : > { %v1554_v21 = vmul.f32 %v2496_v20, %v2494_v6  ;;  %v2407_v20 = vld [vmem:[%s2772_s24 + $0x70] sm:$0xff] }
 0x6eb   : > { %1907 = vmatpush.bf16.msrb.mxu2 %v2407_v20 }
 0x6ec   : > { %v1556_v26 = vpack.c.bf16 %v1554_v21, %v1554_v21  ;;  %v2399_v21 = vld [vmem:[%s2772_s24 + $0x30] sm:$0xff] }
 0x6ef   : > { %1908 = vmatpush.bf16.msrb.mxu2 %v2406_v28 }
 0x6f5   : > { %v1579_v22 = vpop.permute.xlu0 %1578 }
 0x6f6   : > { %v1584_v24 = vsel %vm1138_vm8, %v1579_v22, 0 }
 0x6f7   : > { %1593 = vmatpush.bf16.msrb.mxu1 %v1584_v24 }
 0x6fa   : > { %2288 = vmatmul.msk.bf16.vlgmr.msrb.gmra.mxu1 %vm1070_vm7, %v1556_v26 }
 0x713   : > { %v1478_v25 = vpop.f32.mrf.mxu1 }
 0x714   : > { %v1483_v27 = vadd.f32 %v1478_v25, %v1344_v8 }
 0x71b   : > { %v1480_v30 = vpop.f32.mrf.mxu1 }
 0x71c   : > { %v1484_v40 = vadd.f32 %v1480_v30, %v1346_v39 }
 0x777   : > { %v1595_v31 = vpop.f32.mrf.mxu1 }
 0x778   : > { %v1599_v32 = vpack.c.bf16 %v1595_v31, %v1574_v17  ;;  %v2400_v17 = vld [vmem:[%s2772_s24 + $0x38] sm:$0xff] }
 0x779   : > { %1892 = vmatpush.bf16.msra.mxu1 %v2400_v17 }
 0x77a   : > { %2289 = vmatmul.msk.bf16.vlgmr.msra.gmra.mxu2 %vm1070_vm7, %v1599_v32 }
 0x77d   : > { %1893 = vmatpush.bf16.msra.mxu1 %v2399_v21 }
 0x77f   : > { %v1597_v33 = vpop.f32.mrf.mxu1 }
 0x780   : > { %v2405_v33 = vld [vmem:[%s2772_s24 + $0x60] sm:$0xff] }
 0x781   : > { %1894 = vmatpush.bf16.msra.mxu1 %v2398_v29  ;;  %1909 = vmatpush.bf16.msrb.mxu2 %v2405_v33 }
 0x7fd   : > { %v1615_v34 = vpop.f32.mrf.mxu2 }
 0x7fe   : > { %v1620_v35 = vadd.f32 %v1615_v34, %v1483_v27 }
 0x800   : > { %v1622_v38 = vadd.f32 %v1620_v35, %v2785_v2 }
 0x802   : > { %v2952_v37 = vadd.f32 %v2451_v23, %v1622_v38 }
 0x804   : > { %v1632_v41 = vsel %vm886_vm1, %v2952_v37, 0.0 }
 0x805   : > { %1633 = vadd.xlane.f32.xlu1 %v1632_v41  ;;  %v1617_v42 = vpop.f32.mrf.mxu2 }
 0x806   : > { %v1621_v43 = vadd.f32 %v1617_v42, %v1484_v40  ;;  %v2452_v42 = vld [vmem:[%s3111_s0] ss:$0 sm:$0xff] }
 0x808   : > { %v1623_v44 = vadd.f32 %v1621_v43, %v2789_v4 }
 0x80a   : > { %v2957_v45 = vadd.f32 %v2451_v23, %v1623_v44 }
 0x80c   : > { %v1635_v2 = vsel %vm886_vm1, %v2957_v45, 0.0 }
 0x80d   : > { %1636 = vadd.xlane.f32.xlu2 %v1635_v2 }
 0x878   : > { %v1634_v46 = vpop.xlane.xlu1 %1633 }
 0x879   : > { %v1638_v47 = vmul.f32 %v1634_v46, %v2793_v12  ;;  %v2453_v46 = vld [vmem:[%s3112_s27] ss:$0 sm:$0xff] }
 0x87b   : > { %v2963_v48 = vsub.f32 %v2952_v37, %v1638_v47 }
 0x87d   : > { %v1642_v4 = vmul.f32 %v2963_v48, %v2963_v48 }
 0x87f   : > { %v1644_v49 = vsel %vm886_vm1, %v1642_v4, 0.0 }
 0x880   : > { %1645 = vadd.xlane.f32.xlu0 %v1644_v49  ;;  %v1637_v50 = vpop.xlane.xlu2 %1636 }
 0x881   : > { %v1639_v36 = vmul.f32 %v1637_v50, %v2793_v12  ;;  %v2404_v50 = vld [vmem:[%s2772_s24 + $0x58] sm:$0xff] }
 0x882   : > { %1910 = vmatpush.bf16.msrb.mxu2 %v2404_v50 }
 0x883   : > { %v2970_v51 = vsub.f32 %v2957_v45, %v1639_v36  ;;  %v2397_v36 = vld [vmem:[%s2772_s24 + $0x20] sm:$0xff] }
 0x884   : > { %1895 = vmatpush.bf16.msra.mxu1 %v2397_v36 }
 0x885   : > { %v1643_v52 = vmul.f32 %v2970_v51, %v2970_v51 }
 0x887   : > { %v1647_v54 = vsel %vm886_vm1, %v1643_v52, 0.0  ;;  %v2396_v52 = vld [vmem:[%s2772_s24 + $0x18] sm:$0xff] }
 0x888   : > { %1648 = vadd.xlane.f32.xlu1 %v1647_v54  ;;  %1896 = vmatpush.bf16.msra.mxu1 %v2396_v52  ;;  %v2402_v54 = vld [vmem:[%s2772_s24 + $0x48] sm:$0xff] }
 0x88c   : > { %1897 = vmatpush.bf16.msra.mxu1 %v2395_v55 }
 0x890   : > { %1898 = vmatpush.bf16.msra.mxu1 %v2394_v57 }
 0x894   : > { %1899 = vmatpush.bf16.msra.mxu1 %v2393_v58 }
 0x8f3   : > { %v1646_v61 = vpop.xlane.xlu0 %1645 }
 0x8f4   : > { %v1650_v1 = vmul.f32 0.032258064, %v1646_v61 }
 0x8f6   : > { %2497 = vrsqrt.f32 %v1650_v1  ;;  %vm1659_vm9 = vcmp.eq.f32.partialorder %v1650_v1, inf  ;;  %v1662_v26 = vand.u32 2147483648, %v1650_v1  ;;  %vm1661_vm10 = vcmp.eq.f32.partialorder %v1650_v1, 0.0 }
 0x8fb   : > { %v1649_v6 = vpop.xlane.xlu1 %1648 }
 0x8fc   : > { %v2498_v7 = vpop.eup %2497  ;;  %v1651_v9 = vmul.f32 0.032258064, %v1649_v6 }
 0x8fd   : > { %v1653_v10 = vmul.f32 %v2498_v7, %v1650_v1 }
 0x8fe   : > { %2499 = vrsqrt.f32 %v1651_v9  ;;  %vm1671_vm11 = vcmp.eq.f32.partialorder %v1651_v9, inf  ;;  %v1674_v35 = vand.u32 2147483648, %v1651_v9  ;;  %vm1673_vm12 = vcmp.eq.f32.partialorder %v1651_v9, 0.0 }
 0x8ff   : > { %v1654_v11 = vmul.f32 %v2498_v7, %v1653_v10 }
 0x901   : > { %v1655_v13 = vmul.f32 0.5, %v1654_v11 }
 0x903   : > { %v1656_v14 = vsub.f32 1.5, %v1655_v13 }
 0x904   : > { %v2500_v15 = vpop.eup %2499 }
 0x905   : > { %v1657_v18 = vmul.f32 %v2498_v7, %v1656_v14  ;;  %v1665_v19 = vmul.f32 %v2500_v15, %v1651_v9 }
 0x907   : > { %v1658_v22 = vmul.f32 %v1657_v18, %v1650_v1  ;;  %v1666_v24 = vmul.f32 %v2500_v15, %v1665_v19 }
 0x909   : > { %v1660_v8 = vsel %vm1659_vm9, %v1650_v1, %v1658_v22  ;;  %v1667_v25 = vmul.f32 0.5, %v1666_v24 }
 0x90a   : > { %v1663_v27 = vsel %vm1661_vm10, %v1662_v26, %v1660_v8 }
 0x90b   : > { %v1668_v30 = vsub.f32 1.5, %v1667_v25  ;;  %v1676_v31 = vadd.f32 1e-06, %v1663_v27 }
 0x90d   : > { %v1669_v32 = vmul.f32 %v2500_v15, %v1668_v30  ;;  %2501 = vrcp.f32 %v1676_v31  ;;  %v2454_v15 = vld [vmem:[%s870_s25] ss:$0 sm:$0xff] }
 0x90f   : > { %v1670_v34 = vmul.f32 %v1669_v32, %v1651_v9 }
 0x911   : > { %v1672_v23 = vsel %vm1671_vm11, %v1651_v9, %v1670_v34 }
 0x912   : > { %v1675_v38 = vsel %vm1673_vm12, %v1674_v35, %v1672_v23 }
 0x913   : > { %v1677_v39 = vadd.f32 1e-06, %v1675_v38  ;;  %v2502_v40 = vpop.eup %2501 }
 0x914   : > { %v1680_v41 = vmul.f32 %v2502_v40, %v2963_v48 }
 0x915   : > { %2503 = vrcp.f32 %v1677_v39 }
 0x916   : > { %v1685_v2 = vmul.f32 %v2452_v42, %v1680_v41 }
 0x918   : > { %v1690_v48 = vadd.f32 %v2453_v46, %v1685_v2 }
 0x91b   : > { %v2504_v43 = vpop.eup %2503 }
 0x91c   : > { %v1681_v44 = vmul.f32 %v2504_v43, %v2970_v51  ;;  %v2403_v51 = vld [vmem:[%s2772_s24 + $0x50] sm:$0xff] }
 0x91d   : > { %1911 = vmatpush.bf16.msrb.mxu2 %v2403_v51 }
 0x91e   : > { %v1686_v47 = vmul.f32 %v2452_v42, %v1681_v44 }
 0x920   : > { %v1691_v4 = vadd.f32 %v2453_v46, %v1686_v47 }
 0x921   : > { %1912 = vmatpush.bf16.msrb.mxu2 %v2402_v54 }
 0x922   : > { %v1692_v49 = vpack.c.bf16 %v1691_v4, %v1690_v48 }
 0x924   : > { %2306 = vmatmul.msk.bf16.vlgmr.msra.gmra.mxu3 %vm886_vm1, %v1692_v49  ;;  %2307 = vmatmul.msk.bf16.vlgmr.msra.gmra.mxu0 %vm886_vm1, %v1692_v49 }
 0x925   : > { %1913 = vmatpush.bf16.msrb.mxu2 %v2401_v56 }
 0x9a1   : > { %v1749_v60 = vpop.f32.mrf.mxu0 }
 0x9a2   : > { %v1750_v62 = vadd.f32 %v1749_v60, %v1700_v53 }
 0x9a4   : > { %v1755_v3 = vmax.f32 %v1750_v62, 0.0 }
 0x9a7   : > { %v1735_v61 = vpop.f32.mrf.mxu3 }
 0x9a8   : > { %v1736_v6 = vadd.f32 %v1735_v61, %v1699_v0 }
 0x9a9   : > { %v1751_v63 = vpop.f32.mrf.mxu0 }
 0x9aa   : > { %v1752_v1 = vadd.f32 %v1751_v63, %v1700_v53  ;;  %v1754_v11 = vmax.f32 %v1736_v6, 0.0 }
 0x9ac   : > { %v1757_v5 = vmax.f32 %v1752_v1, 0.0 }
 0x9ae   : > { %v1759_v7 = vpack.c.bf16 %v1757_v5, %v1755_v3 }
 0x9af   : > { %v1737_v9 = vpop.f32.mrf.mxu3 }
 0x9b0   : > { %v1738_v10 = vadd.f32 %v1737_v9, %v1699_v0  ;;  %1914 = vmatmul.bf16.vlgmr.msrb.gmra.mxu2 %v1759_v7 }
 0x9b2   : > { %v1756_v13 = vmax.f32 %v1738_v10, 0.0 }
 0x9b4   : > { %v1758_v14 = vpack.c.bf16 %v1756_v13, %v1754_v11 }
 0x9b6   : > { %1900 = vmatmul.bf16.vlgmr.msra.gmra.mxu1 %v1758_v14 }
 0xa33   : > { %v1901_v16 = vpop.f32.mrf.mxu1  ;;  %v1915_v17 = vpop.f32.mrf.mxu2 }
 0xa34   : > { %v1902_v18 = vadd.f32 %v2454_v15, %v1901_v16 }
 0xa36   : > { %v1916_v19 = vadd.f32 %v1915_v17, %v1902_v18 }
 0xa38   : > { %v1920_v20 = vadd.f32 %v1916_v19, %v2952_v37 }
 0xa3a   : > { %1922 = vst.msk [vmem:[#allocation2] sm:$0xff] %vm886_vm1, %v1920_v20 }
 0xa3b   : > { %v1903_v21 = vpop.f32.mrf.mxu1  ;;  %v1917_v24 = vpop.f32.mrf.mxu2 }
 0xa3c   : > { %v1904_v22 = vadd.f32 %v2454_v15, %v1903_v21 }
 0xa3e   : > { %v1918_v26 = vadd.f32 %v1917_v24, %v1904_v22  ;;  %1927 = sbr.rel (%p2372_p6) target bundleno = 2914 (0xb62), region = 104 }
 0xa40   : > { %v1921_v8 = vadd.f32 %v1918_v26, %v2957_v45 }
 0xa42   : > { %1923 = vst.msk [vmem:[#allocation2 + $0x8] sm:$0xff] %vm886_vm1, %v1921_v8 }
 0xa43   : > { %v1930_v25 = vsel %vm886_vm1, %v1920_v20, 0.0  ;;  %v1933_v27 = vsel %vm886_vm1, %v1921_v8, 0.0  ;;  %v2505_v59 = vld [vmem:[%s3115_s30] ss:$0 sm:$0xff] }
 0xa44   : > { %1931 = vadd.xlane.f32.xlu0 %v1930_v25  ;;  %v2506_v63 = vld [vmem:[%s3116_s5] ss:$0 sm:$0xff] }
 0xa4c   : > { %1934 = vadd.xlane.f32.xlu0 %v1933_v27 }
 0xab7   : > { %v1932_v37 = vpop.xlane.xlu0 %1931 }
 0xab8   : > { %v1936_v28 = vmul.f32 %v1932_v37, %v2793_v12 }
 0xaba   : > { %v1938_v29 = vsub.f32 %v1920_v20, %v1936_v28 }
 0xabc   : > { %v1940_v30 = vmul.f32 %v1938_v29, %v1938_v29 }
 0xabe   : > { %v1942_v31 = vsel %vm886_vm1, %v1940_v30, 0.0 }
 0xabf   : > { %1943 = vadd.xlane.f32.xlu1 %v1942_v31  ;;  %v1935_v45 = vpop.xlane.xlu0 %1934 }
 0xac0   : > { %v1937_v32 = vmul.f32 %v1935_v45, %v2793_v12 }
 0xac2   : > { %v1939_v33 = vsub.f32 %v1921_v8, %v1937_v32 }
 0xac4   : > { %v1941_v34 = vmul.f32 %v1939_v33, %v1939_v33 }
 0xac6   : > { %v1945_v35 = vsel %vm886_vm1, %v1941_v34, 0.0 }
 0xac7   : > { %1946 = vadd.xlane.f32.xlu1 %v1945_v35 }
 0xb32   : > { %v1944_v23 = vpop.xlane.xlu1 %1943 }
 0xb33   : > { %v1948_v38 = vmul.f32 0.032258064, %v1944_v23 }
 0xb35   : > { %2507 = vrsqrt.f32 %v1948_v38  ;;  %vm1957_vm13 = vcmp.eq.f32.partialorder %v1948_v38, inf  ;;  %v1960_v49 = vand.u32 2147483648, %v1948_v38  ;;  %vm1959_vm14 = vcmp.eq.f32.partialorder %v1948_v38, 0.0 }
 0xb3a   : > { %v1947_v39 = vpop.xlane.xlu1 %1946 }
 0xb3b   : > { %v2508_v40 = vpop.eup %2507  ;;  %v1949_v41 = vmul.f32 0.032258064, %v1947_v39 }
 0xb3c   : > { %v1951_v42 = vmul.f32 %v2508_v40, %v1948_v38 }
 0xb3d   : > { %2509 = vrsqrt.f32 %v1949_v41  ;;  %vm1969_vm15 = vcmp.eq.f32.partialorder %v1949_v41, inf  ;;  %v1972_v57 = vand.u32 2147483648, %v1949_v41  ;;  %vm1971_vm0 = vcmp.eq.f32.partialorder %v1949_v41, 0.0 }
 0xb3e   : > { %v1952_v43 = vmul.f32 %v2508_v40, %v1951_v42 }
 0xb40   : > { %v1953_v44 = vmul.f32 0.5, %v1952_v43 }
 0xb42   : > { %v1954_v2 = vsub.f32 1.5, %v1953_v44 }
 0xb43   : > { %v2510_v46 = vpop.eup %2509 }
 0xb44   : > { %v1955_v47 = vmul.f32 %v2508_v40, %v1954_v2  ;;  %v1963_v48 = vmul.f32 %v2510_v46, %v1949_v41 }
 0xb46   : > { %v1956_v12 = vmul.f32 %v1955_v47, %v1948_v38  ;;  %v1964_v4 = vmul.f32 %v2510_v46, %v1963_v48 }
 0xb48   : > { %v1958_v50 = vsel %vm1957_vm13, %v1948_v38, %v1956_v12  ;;  %v1965_v36 = vmul.f32 0.5, %v1964_v4 }
 0xb49   : > { %v1961_v51 = vsel %vm1959_vm14, %v1960_v49, %v1958_v50 }
 0xb4a   : > { %v1974_v52 = vadd.f32 1e-06, %v1961_v51  ;;  %v1966_v54 = vsub.f32 1.5, %v1965_v36 }
 0xb4c   : > { %2511 = vrcp.f32 %v1974_v52  ;;  %v1967_v55 = vmul.f32 %v2510_v46, %v1966_v54 }
 0xb4e   : > { %v1968_v56 = vmul.f32 %v1967_v55, %v1949_v41 }
 0xb50   : > { %v1970_v58 = vsel %vm1969_vm15, %v1949_v41, %v1968_v56 }
 0xb51   : > { %v1973_v60 = vsel %vm1971_vm0, %v1972_v57, %v1970_v58 }
 0xb52   : > { %v2512_v53 = vpop.eup %2511  ;;  %v1975_v61 = vadd.f32 1e-06, %v1973_v60 }
 0xb53   : > { %v1978_v62 = vmul.f32 %v2512_v53, %v1938_v29 }
 0xb54   : > { %2513 = vrcp.f32 %v1975_v61 }
 0xb55   : > { %v1983_v0 = vmul.f32 %v2505_v59, %v1978_v62 }
 0xb57   : > { %v1988_v1 = vadd.f32 %v2506_v63, %v1983_v0 }
 0xb59   : > { %1990 = vst.msk [vmem:[#allocation3] sm:$0xff] %vm886_vm1, %v1988_v1 }
 0xb5a   : > { %v2514_v3 = vpop.eup %2513 }
 0xb5b   : > { %v1979_v5 = vmul.f32 %v2514_v3, %v1939_v33 }
 0xb5d   : > { %v1984_v6 = vmul.f32 %v2505_v59, %v1979_v5 }
 0xb5f   : > { %v1989_v7 = vadd.f32 %v2506_v63, %v1984_v6 }
 0xb61   : > { %1991 = vst.msk [vmem:[#allocation3 + $0x8] sm:$0xff] %vm886_vm1, %v1989_v7 }
 0xb62 PF: > { %s3117_s17 = sld [smem:[#allocation8_spill]]  ;;  %s2575_s21 = smov [#allocation3]  }
 0xb63   : > { %s3119_s2 = sld [smem:[#allocation21_spill]]  ;;  %s2000_s1 = sshll.u32 %s2575_s21, 4  ;;  %s2001_s1 = int_to_ptr.vmem [resolvable:$true] %s2000_s1 }
 0xb64   : > { %s2576_s0 = smov 128   ;;  %s2577_s4 = smov 8  }
 0xb68   : > { %s3118_s19 = sadd.s32 4294967295, %s3117_s17  }
 0xb69   : > { %p2413_p7 = scmp.eq.s32.totalorder %s3118_s19, 1  ;;  %s2002_s20 = sshll.u32 %s3119_s2, 4  ;;  %s2003_s20 = int_to_ptr.hbm [resolvable:$true] %s2002_s20 }
 0xb6b   : > { %2410 = dma.vmem_to_hbm [thread:$0]  (%p2413_p7), %s2001_s1, 256, %s2003_s20, [#allocation4], %s2576_s0, %s2576_s0, %s2577_s4  }
 0xb6c   : > { %2556 = dma.done.wait (%p2413_p7), [#allocation4], 256  }
 0xb6d   : > { %2558 = vsyncadd (%p2413_p7), [#allocation4], 4294967040 }
 0xb6e PF: > { %s3120_s26 = sld [smem:[#allocation8_spill]] }
 0xb6f   : > { %s3121_s0 = sld [smem:[#allocation7_spill]] }
 0xb70   : > { %s3122_s30 = sld [smem:[#allocation9_spill]] }
 0xb74   : > { %s30_s20 = sadd.s32 1, %s3120_s26  }
 0xb75   : > { %p27_p8 = scmp.ge.s32.totalorder %s30_s20, 4  }
 0xb77   :  { %29 = sbr.rel (!%p27_p8) target bundleno = 15 (0xf), region = 180 }
 0xb7c   :  { %2019 = vsyncpa [#allocation4], 1 }
 0xb7d   :  { %2021 = vsyncpa [#allocation4 + $0x1], 1 }

</bundles_post_ra>
